<compile_context>
chip_gen: v5e
topology: v5e:2x2
jax: 0.10.0
libtpu: 0.0.40
codegen_flags: <defaults>
</compile_context>

<pallas_src>
import functools

import jax
import jax.numpy as jnp
from jax import lax
from jax.experimental import pallas as pl
from jax.experimental.pallas import tpu as pltpu


def _round_up(x, m):
    return ((x + m - 1) // m) * m


def _lstm_recurrence_kernel(seq_len, gx_ref, whh_ref, h0_ref, c0_ref,
                            hseq_ref, h_ref, c_ref):
    """One grid step processes a chunk of `t_blk` timesteps.

    gx_ref  : (t_blk, Bp, 4*Hp)  precomputed x_t @ W_ih^T + (b_ih + b_hh), per-gate lane-padded
    whh_ref : (Hp, 4*Hp)         W_hh^T (pre-transposed in HBM, per-gate lane-padded)
    h0/c0   : (Bp, Hp)           initial state
    hseq    : (t_blk, Bp, Hp)    hidden state at every timestep of this chunk
    h/c     : (Bp, Hp)           running state, resident in VMEM across the whole grid
    """
    tb = pl.program_id(0)
    t_blk = gx_ref.shape[0]
    Hp = whh_ref.shape[0]

    @pl.when(tb == 0)
    def _():
        h_ref[...] = h0_ref[...]
        c_ref[...] = c0_ref[...]

    whh = whh_ref[...]            # loaded once per grid step; no transpose in-kernel
    base_t = tb * t_blk

    def step(tt, carry):
        h, c = carry
        # gates = gates_x[t] + h @ W_hh^T   -> (Bp, 4*Hp), f32 accumulation on the MXU
        gates = gx_ref[tt].astype(jnp.float32) + jnp.dot(
            h.astype(whh.dtype), whh, preferred_element_type=jnp.float32)
        # PyTorch gate order i, f, g, o; each slice is 128-lane aligned (Hp % 128 == 0).
        i_g = jax.nn.sigmoid(gates[:, 0 * Hp:1 * Hp])
        f_g = jax.nn.sigmoid(gates[:, 1 * Hp:2 * Hp])
        g_g = jnp.tanh(gates[:, 2 * Hp:3 * Hp])
        o_g = jax.nn.sigmoid(gates[:, 3 * Hp:4 * Hp])
        c_new = f_g * c + i_g * g_g
        h_new = o_g * jnp.tanh(c_new)
        # Freeze the state on padded timesteps (t >= seq_len) so the final (h, c) stay exact.
        valid = (base_t + tt) < seq_len
        h_new = jnp.where(valid, h_new, h)
        c_new = jnp.where(valid, c_new, c)
        hseq_ref[tt] = h_new.astype(hseq_ref.dtype)
        return h_new, c_new

    h_fin, c_fin = lax.fori_loop(0, t_blk, step, (h_ref[...], c_ref[...]),
                                 unroll=True)
    h_ref[...] = h_fin
    c_ref[...] = c_fin


def lstm_forward(x, w_ih, w_hh, b_ih, b_hh, h0=None, c0=None, *,
                 t_blk=16, param_dtype=jnp.float32):
    """Single-layer LSTM forward, same semantics as torch.nn.LSTM (+ optional h0/c0).

    x    : (S, B, I) float32, time-major (batch_first=False)
    w_ih : (4H, I), w_hh: (4H, H), b_ih/b_hh: (4H,)   (PyTorch gate order i, f, g, o)
    h0/c0: optional (1, B, H) or (B, H); zeros if None.

    Returns (h_seq, (h_n, c_n)) with shapes (S, B, H), (1, B, H), (1, B, H).
    """
    S, B, I = x.shape
    H = w_hh.shape[1]
    assert S >= 1, "empty sequences are not supported"

    f32 = jnp.float32
    Hp = max(128, _round_up(H, 128))       # lane-align each gate slice
    Bp = max(8, _round_up(B, 8))           # sublane-align the batch
    t_blk = max(1, min(t_blk, S))          # chunk of timesteps per grid step
    Sp = _round_up(S, t_blk)               # padded sequence length (masked in-kernel)

    x = x.astype(f32)

    # --- Input projection hoisted out of the recurrence: one big, MXU-efficient matmul.
    bias = (b_ih + b_hh).astype(f32)
    gx = jnp.einsum("sbi,gi->sbg", x, w_ih.astype(f32)) + bias          # (S, B, 4H)
    # Pad per gate so every gate block starts on a 128-lane boundary; pad batch/time.
    gx = gx.reshape(S, B, 4, H)
    gx = jnp.pad(gx, ((0, Sp - S), (0, Bp - B), (0, 0), (0, Hp - H)))
    gx = gx.reshape(Sp, Bp, 4 * Hp).astype(param_dtype)

    # --- W_hh^T: transposed ONCE in HBM (no .T inside the kernel), per-gate lane-padded.
    whh_t = w_hh.astype(f32).T.reshape(H, 4, H)                          # (H, 4, H)
    whh_t = jnp.pad(whh_t, ((0, Hp - H), (0, 0), (0, Hp - H)))
    whh_t = whh_t.reshape(Hp, 4 * Hp).astype(param_dtype)

    def _prep_state(s):
        if s is None:
            return jnp.zeros((Bp, Hp), f32)
        s = jnp.asarray(s, f32).reshape(B, H)
        return jnp.pad(s, ((0, Bp - B), (0, Hp - H)))

    h0_p = _prep_state(h0)
    c0_p = _prep_state(c0)

    kernel = functools.partial(_lstm_recurrence_kernel, S)

    hseq_p, h_p, c_p = pl.pallas_call(
        kernel,
        out_shape=(
            jax.ShapeDtypeStruct((Sp, Bp, Hp), f32),   # h_seq (padded)
            jax.ShapeDtypeStruct((Bp, Hp), f32),       # final h
            jax.ShapeDtypeStruct((Bp, Hp), f32),       # final c
        ),
        grid_spec=pltpu.PrefetchScalarGridSpec(
            num_scalar_prefetch=0,
            grid=(Sp // t_blk,),
            in_specs=[
                pl.BlockSpec((t_blk, Bp, 4 * Hp), lambda t: (t, 0, 0)),  # gates_x chunk
                pl.BlockSpec((Hp, 4 * Hp), lambda t: (0, 0)),            # W_hh^T (constant index)
                pl.BlockSpec((Bp, Hp), lambda t: (0, 0)),                # h0
                pl.BlockSpec((Bp, Hp), lambda t: (0, 0)),                # c0
            ],
            out_specs=[
                pl.BlockSpec((t_blk, Bp, Hp), lambda t: (t, 0, 0)),      # h_seq chunk (lane-dense)
                pl.BlockSpec((Bp, Hp), lambda t: (0, 0)),                # h state (resident)
                pl.BlockSpec((Bp, Hp), lambda t: (0, 0)),                # c state (resident)
            ],
        ),
        compiler_params=pltpu.CompilerParams(
            dimension_semantics=("arbitrary",),   # time is inherently sequential
        ),
    )(gx, whh_t, h0_p, c0_p)

    h_seq = hseq_p[:S, :B, :H]
    h_n = h_p[:B, :H][None]
    c_n = c_p[:B, :H][None]
    return h_seq, (h_n, c_n)


def _lstm_reference(x, w_ih, w_hh, b_ih, b_hh, h0=None, c0=None):
    """Pure-JAX reference matching torch.nn.LSTM semantics."""
    S, B, I = x.shape
    H = w_hh.shape[1]
    h = jnp.zeros((B, H), jnp.float32) if h0 is None else jnp.asarray(h0, jnp.float32).reshape(B, H)
    c = jnp.zeros((B, H), jnp.float32) if c0 is None else jnp.asarray(c0, jnp.float32).reshape(B, H)

    def step(carry, x_t):
        h, c = carry
        gates = x_t @ w_ih.T + b_ih + h @ w_hh.T + b_hh
        i_g = jax.nn.sigmoid(gates[:, 0 * H:1 * H])
        f_g = jax.nn.sigmoid(gates[:, 1 * H:2 * H])
        g_g = jnp.tanh(gates[:, 2 * H:3 * H])
        o_g = jax.nn.sigmoid(gates[:, 3 * H:4 * H])
        c = f_g * c + i_g * g_g
        h = o_g * jnp.tanh(c)
        return (h, c), h

    (h, c), h_seq = lax.scan(step, (h, c), x)
    return h_seq, (h[None], c[None])


if __name__ == "__main__":
    # Small shapes consistent with the module's forward (seq, batch, input_size).
    # S is deliberately not a multiple of t_blk to exercise the padded/masked path.
    S, B, I, H = 10, 4, 16, 32

    key = jax.random.PRNGKey(0)
    ks = jax.random.split(key, 7)
    bound = 1.0 / jnp.sqrt(H)   # PyTorch default init: U(-1/sqrt(H), 1/sqrt(H))

    x = jax.random.normal(ks[0], (S, B, I), jnp.float32)
    w_ih = jax.random.uniform(ks[1], (4 * H, I), jnp.float32, -bound, bound)
    w_hh = jax.random.uniform(ks[2], (4 * H, H), jnp.float32, -bound, bound)
    b_ih = jax.random.uniform(ks[3], (4 * H,), jnp.float32, -bound, bound)
    b_hh = jax.random.uniform(ks[4], (4 * H,), jnp.float32, -bound, bound)
    h0 = jax.random.normal(ks[5], (1, B, H), jnp.float32)
    c0 = jax.random.normal(ks[6], (1, B, H), jnp.float32)

    # Run 1: default zero initial state (module called as forward(x)).
    h_seq, (h_n, c_n) = lstm_forward(x, w_ih, w_hh, b_ih, b_hh, t_blk=8)
    jax.block_until_ready((h_seq, h_n, c_n))
    r_seq, (r_h, r_c) = _lstm_reference(x, w_ih, w_hh, b_ih, b_hh)
    assert h_seq.shape == (S, B, H) and h_n.shape == (1, B, H) and c_n.shape == (1, B, H)
    assert jnp.allclose(h_seq, r_seq, atol=1e-4, rtol=1e-4), "h_seq mismatch vs reference"
    assert jnp.allclose(h_n, r_h, atol=1e-4, rtol=1e-4), "h_n mismatch vs reference"
    assert jnp.allclose(c_n, r_c, atol=1e-4, rtol=1e-4), "c_n mismatch vs reference"

    # Run 2: explicit (h, c) initial state, matching forward(x, h, c).
    h_seq2, (h_n2, c_n2) = lstm_forward(x, w_ih, w_hh, b_ih, b_hh, h0, c0, t_blk=8)
    jax.block_until_ready((h_seq2, h_n2, c_n2))
    r_seq2, (r_h2, r_c2) = _lstm_reference(x, w_ih, w_hh, b_ih, b_hh, h0, c0)
    assert jnp.allclose(h_seq2, r_seq2, atol=1e-4, rtol=1e-4), "h_seq mismatch (explicit h0/c0)"
    assert jnp.allclose(h_n2, r_h2, atol=1e-4, rtol=1e-4), "h_n mismatch (explicit h0/c0)"
    assert jnp.allclose(c_n2, r_c2, atol=1e-4, rtol=1e-4), "c_n mismatch (explicit h0/c0)"

    print("KERNEL_OK")
</pallas_src>

<mosaic_0001>
module attributes {stable_mosaic.version = 11 : i64} {
  func.func @_lstm_recurrence_kernel(%arg0: i32, %arg1: memref<8x8x512xf32, #tpu.memory_space<vmem>>, %arg2: memref<128x512xf32, #tpu.memory_space<vmem>>, %arg3: memref<8x128xf32, #tpu.memory_space<vmem>>, %arg4: memref<8x128xf32, #tpu.memory_space<vmem>>, %arg5: memref<8x8x128xf32, #tpu.memory_space<vmem>>, %arg6: memref<8x128xf32, #tpu.memory_space<vmem>>, %arg7: memref<8x128xf32, #tpu.memory_space<vmem>>) attributes {dimension_semantics = [#tpu.dimension_semantics<arbitrary>], iteration_bounds = array<i64: 2>, scalar_prefetch = 0 : i64, scratch_operands = 0 : i64, tpu.core_type = #tpu.core_type<tc>, window_params = [{transform_indices = @transform_0, window_bounds = array<i64: 8, 8, 512>}, {pipeline_mode = #tpu.pipeline_mode<synchronous>, transform_indices = @transform_1, window_bounds = array<i64: 128, 512>}, {pipeline_mode = #tpu.pipeline_mode<synchronous>, transform_indices = @transform_2, window_bounds = array<i64: 8, 128>}, {pipeline_mode = #tpu.pipeline_mode<synchronous>, transform_indices = @transform_3, window_bounds = array<i64: 8, 128>}, {transform_indices = @transform_4, window_bounds = array<i64: 8, 8, 128>}, {pipeline_mode = #tpu.pipeline_mode<synchronous>, transform_indices = @transform_5, window_bounds = array<i64: 8, 128>}, {pipeline_mode = #tpu.pipeline_mode<synchronous>, transform_indices = @transform_6, window_bounds = array<i64: 8, 128>}]} {
    %c0_i32 = arith.constant 0 : i32
    %0 = arith.cmpi eq, %arg0, %c0_i32 : i32
    %1 = arith.extui %0 : i1 to i32
    %c0_i32_0 = arith.constant 0 : i32
    %2 = arith.cmpi ne, %1, %c0_i32_0 : i32
    scf.if %2 {
      %c0_82 = arith.constant 0 : index
      %c0_83 = arith.constant 0 : index
      %313 = vector.load %arg3[%c0_82, %c0_83] : memref<8x128xf32, #tpu.memory_space<vmem>>, vector<8x128xf32>
      %c0_84 = arith.constant 0 : index
      %c0_85 = arith.constant 0 : index
      %314 = vector.load %arg6[%c0_84, %c0_85] : memref<8x128xf32, #tpu.memory_space<vmem>>, vector<8x128xf32>
      tpu.vector_store %arg6[%c0_84, %c0_85], %313 {strides = array<i32>} : memref<8x128xf32, #tpu.memory_space<vmem>>, vector<8x128xf32>,
      %c0_86 = arith.constant 0 : index
      %c0_87 = arith.constant 0 : index
      %315 = vector.load %arg4[%c0_86, %c0_87] : memref<8x128xf32, #tpu.memory_space<vmem>>, vector<8x128xf32>
      %c0_88 = arith.constant 0 : index
      %c0_89 = arith.constant 0 : index
      %316 = vector.load %arg7[%c0_88, %c0_89] : memref<8x128xf32, #tpu.memory_space<vmem>>, vector<8x128xf32>
      tpu.vector_store %arg7[%c0_88, %c0_89], %315 {strides = array<i32>} : memref<8x128xf32, #tpu.memory_space<vmem>>, vector<8x128xf32>,
    } else {
    }
    %c0 = arith.constant 0 : index
    %c0_1 = arith.constant 0 : index
    %3 = vector.load %arg2[%c0, %c0_1] : memref<128x512xf32, #tpu.memory_space<vmem>>, vector<128x512xf32>
    %c8_i32 = arith.constant 8 : i32
    %4 = arith.muli %arg0, %c8_i32 : i32
    %c0_2 = arith.constant 0 : index
    %c0_3 = arith.constant 0 : index
    %5 = vector.load %arg6[%c0_2, %c0_3] : memref<8x128xf32, #tpu.memory_space<vmem>>, vector<8x128xf32>
    %c0_4 = arith.constant 0 : index
    %c0_5 = arith.constant 0 : index
    %6 = vector.load %arg7[%c0_4, %c0_5] : memref<8x128xf32, #tpu.memory_space<vmem>>, vector<8x128xf32>
    %c0_i32_6 = arith.constant 0 : i32
    %7 = arith.index_cast %c0_i32_6 : i32 to index
    %c0_7 = arith.constant 0 : index
    %c0_8 = arith.constant 0 : index
    %8 = vector.load %arg1[%7, %c0_7, %c0_8] : memref<8x8x512xf32, #tpu.memory_space<vmem>>, vector<1x8x512xf32>
    %9 = vector.shape_cast %8 : vector<1x8x512xf32> to vector<8x512xf32>
    %cst = arith.constant dense<0.000000e+00> : vector<8x512xf32>
    %10 = tpu.matmul %5, %3, %cst {dimension_numbers = #tpu.dot_dimension_numbers<[1], [0], [0], [1], [0, 0, 1, 1], [], []>} : vector<8x128xf32>, vector<128x512xf32>, vector<8x512xf32> -> vector<8x512xf32>
    %11 = arith.addf %9, %10 : vector<8x512xf32>
    %12 = vector.extract_strided_slice %11 {offsets = [0, 0], sizes = [8, 128], strides = [1, 1]} : vector<8x512xf32> to vector<8x128xf32>
    %13 = arith.negf %12 : vector<8x128xf32>
    %14 = math.exp %13 : vector<8x128xf32>
    %cst_9 = arith.constant 1.000000e+00 : f32
    %15 = vector.broadcast %cst_9 : f32 to vector<8x128xf32>
    %16 = arith.addf %15, %14 : vector<8x128xf32>
    %17 = arith.divf %15, %16 : vector<8x128xf32>
    %18 = vector.extract_strided_slice %11 {offsets = [0, 128], sizes = [8, 128], strides = [1, 1]} : vector<8x512xf32> to vector<8x128xf32>
    %19 = arith.negf %18 : vector<8x128xf32>
    %20 = math.exp %19 : vector<8x128xf32>
    %cst_10 = arith.constant 1.000000e+00 : f32
    %21 = vector.broadcast %cst_10 : f32 to vector<8x128xf32>
    %22 = arith.addf %21, %20 : vector<8x128xf32>
    %23 = arith.divf %21, %22 : vector<8x128xf32>
    %24 = vector.extract_strided_slice %11 {offsets = [0, 256], sizes = [8, 128], strides = [1, 1]} : vector<8x512xf32> to vector<8x128xf32>
    %25 = math.tanh %24 : vector<8x128xf32>
    %26 = vector.extract_strided_slice %11 {offsets = [0, 384], sizes = [8, 128], strides = [1, 1]} : vector<8x512xf32> to vector<8x128xf32>
    %27 = arith.negf %26 : vector<8x128xf32>
    %28 = math.exp %27 : vector<8x128xf32>
    %cst_11 = arith.constant 1.000000e+00 : f32
    %29 = vector.broadcast %cst_11 : f32 to vector<8x128xf32>
    %30 = arith.addf %29, %28 : vector<8x128xf32>
    %31 = arith.divf %29, %30 : vector<8x128xf32>
    %32 = arith.mulf %23, %6 : vector<8x128xf32>
    %33 = arith.mulf %17, %25 : vector<8x128xf32>
    %34 = arith.addf %32, %33 : vector<8x128xf32>
    %35 = math.tanh %34 : vector<8x128xf32>
    %36 = arith.mulf %31, %35 : vector<8x128xf32>
    %37 = arith.addi %4, %c0_i32_6 : i32
    %c10_i32 = arith.constant 10 : i32
    %38 = arith.cmpi slt, %37, %c10_i32 : i32
    %39 = arith.select %38, %36, %5 : vector<8x128xf32>
    %40 = arith.select %38, %34, %6 : vector<8x128xf32>
    %41 = arith.index_cast %c0_i32_6 : i32 to index
    %c0_12 = arith.constant 0 : index
    %c0_13 = arith.constant 0 : index
    %42 = vector.load %arg5[%41, %c0_12, %c0_13] : memref<8x8x128xf32, #tpu.memory_space<vmem>>, vector<1x8x128xf32>
    %43 = vector.shape_cast %42 : vector<1x8x128xf32> to vector<8x128xf32>
    %44 = vector.shape_cast %39 : vector<8x128xf32> to vector<1x8x128xf32>
    tpu.vector_store %arg5[%41, %c0_12, %c0_13], %44 {strides = array<i32>} : memref<8x8x128xf32, #tpu.memory_space<vmem>>, vector<1x8x128xf32>,
    %c1_i32 = arith.constant 1 : i32
    %45 = arith.index_cast %c1_i32 : i32 to index
    %c0_14 = arith.constant 0 : index
    %c0_15 = arith.constant 0 : index
    %46 = vector.load %arg1[%45, %c0_14, %c0_15] : memref<8x8x512xf32, #tpu.memory_space<vmem>>, vector<1x8x512xf32>
    %47 = vector.shape_cast %46 : vector<1x8x512xf32> to vector<8x512xf32>
    %cst_16 = arith.constant dense<0.000000e+00> : vector<8x512xf32>
    %48 = tpu.matmul %39, %3, %cst_16 {dimension_numbers = #tpu.dot_dimension_numbers<[1], [0], [0], [1], [0, 0, 1, 1], [], []>} : vector<8x128xf32>, vector<128x512xf32>, vector<8x512xf32> -> vector<8x512xf32>
    %49 = arith.addf %47, %48 : vector<8x512xf32>
    %50 = vector.extract_strided_slice %49 {offsets = [0, 0], sizes = [8, 128], strides = [1, 1]} : vector<8x512xf32> to vector<8x128xf32>
    %51 = arith.negf %50 : vector<8x128xf32>
    %52 = math.exp %51 : vector<8x128xf32>
    %cst_17 = arith.constant 1.000000e+00 : f32
    %53 = vector.broadcast %cst_17 : f32 to vector<8x128xf32>
    %54 = arith.addf %53, %52 : vector<8x128xf32>
    %55 = arith.divf %53, %54 : vector<8x128xf32>
    %56 = vector.extract_strided_slice %49 {offsets = [0, 128], sizes = [8, 128], strides = [1, 1]} : vector<8x512xf32> to vector<8x128xf32>
    %57 = arith.negf %56 : vector<8x128xf32>
    %58 = math.exp %57 : vector<8x128xf32>
    %cst_18 = arith.constant 1.000000e+00 : f32
    %59 = vector.broadcast %cst_18 : f32 to vector<8x128xf32>
    %60 = arith.addf %59, %58 : vector<8x128xf32>
    %61 = arith.divf %59, %60 : vector<8x128xf32>
    %62 = vector.extract_strided_slice %49 {offsets = [0, 256], sizes = [8, 128], strides = [1, 1]} : vector<8x512xf32> to vector<8x128xf32>
    %63 = math.tanh %62 : vector<8x128xf32>
    %64 = vector.extract_strided_slice %49 {offsets = [0, 384], sizes = [8, 128], strides = [1, 1]} : vector<8x512xf32> to vector<8x128xf32>
    %65 = arith.negf %64 : vector<8x128xf32>
    %66 = math.exp %65 : vector<8x128xf32>
    %cst_19 = arith.constant 1.000000e+00 : f32
    %67 = vector.broadcast %cst_19 : f32 to vector<8x128xf32>
    %68 = arith.addf %67, %66 : vector<8x128xf32>
    %69 = arith.divf %67, %68 : vector<8x128xf32>
    %70 = arith.mulf %61, %40 : vector<8x128xf32>
    %71 = arith.mulf %55, %63 : vector<8x128xf32>
    %72 = arith.addf %70, %71 : vector<8x128xf32>
    %73 = math.tanh %72 : vector<8x128xf32>
    %74 = arith.mulf %69, %73 : vector<8x128xf32>
    %75 = arith.addi %4, %c1_i32 : i32
    %c10_i32_20 = arith.constant 10 : i32
    %76 = arith.cmpi slt, %75, %c10_i32_20 : i32
    %77 = arith.select %76, %74, %39 : vector<8x128xf32>
    %78 = arith.select %76, %72, %40 : vector<8x128xf32>
    %79 = arith.index_cast %c1_i32 : i32 to index
    %c0_21 = arith.constant 0 : index
    %c0_22 = arith.constant 0 : index
    %80 = vector.load %arg5[%79, %c0_21, %c0_22] : memref<8x8x128xf32, #tpu.memory_space<vmem>>, vector<1x8x128xf32>
    %81 = vector.shape_cast %80 : vector<1x8x128xf32> to vector<8x128xf32>
    %82 = vector.shape_cast %77 : vector<8x128xf32> to vector<1x8x128xf32>
    tpu.vector_store %arg5[%79, %c0_21, %c0_22], %82 {strides = array<i32>} : memref<8x8x128xf32, #tpu.memory_space<vmem>>, vector<1x8x128xf32>,
    %c2_i32 = arith.constant 2 : i32
    %83 = arith.index_cast %c2_i32 : i32 to index
    %c0_23 = arith.constant 0 : index
    %c0_24 = arith.constant 0 : index
    %84 = vector.load %arg1[%83, %c0_23, %c0_24] : memref<8x8x512xf32, #tpu.memory_space<vmem>>, vector<1x8x512xf32>
    %85 = vector.shape_cast %84 : vector<1x8x512xf32> to vector<8x512xf32>
    %cst_25 = arith.constant dense<0.000000e+00> : vector<8x512xf32>
    %86 = tpu.matmul %77, %3, %cst_25 {dimension_numbers = #tpu.dot_dimension_numbers<[1], [0], [0], [1], [0, 0, 1, 1], [], []>} : vector<8x128xf32>, vector<128x512xf32>, vector<8x512xf32> -> vector<8x512xf32>
    %87 = arith.addf %85, %86 : vector<8x512xf32>
    %88 = vector.extract_strided_slice %87 {offsets = [0, 0], sizes = [8, 128], strides = [1, 1]} : vector<8x512xf32> to vector<8x128xf32>
    %89 = arith.negf %88 : vector<8x128xf32>
    %90 = math.exp %89 : vector<8x128xf32>
    %cst_26 = arith.constant 1.000000e+00 : f32
    %91 = vector.broadcast %cst_26 : f32 to vector<8x128xf32>
    %92 = arith.addf %91, %90 : vector<8x128xf32>
    %93 = arith.divf %91, %92 : vector<8x128xf32>
    %94 = vector.extract_strided_slice %87 {offsets = [0, 128], sizes = [8, 128], strides = [1, 1]} : vector<8x512xf32> to vector<8x128xf32>
    %95 = arith.negf %94 : vector<8x128xf32>
    %96 = math.exp %95 : vector<8x128xf32>
    %cst_27 = arith.constant 1.000000e+00 : f32
    %97 = vector.broadcast %cst_27 : f32 to vector<8x128xf32>
    %98 = arith.addf %97, %96 : vector<8x128xf32>
    %99 = arith.divf %97, %98 : vector<8x128xf32>
    %100 = vector.extract_strided_slice %87 {offsets = [0, 256], sizes = [8, 128], strides = [1, 1]} : vector<8x512xf32> to vector<8x128xf32>
    %101 = math.tanh %100 : vector<8x128xf32>
    %102 = vector.extract_strided_slice %87 {offsets = [0, 384], sizes = [8, 128], strides = [1, 1]} : vector<8x512xf32> to vector<8x128xf32>
    %103 = arith.negf %102 : vector<8x128xf32>
    %104 = math.exp %103 : vector<8x128xf32>
    %cst_28 = arith.constant 1.000000e+00 : f32
    %105 = vector.broadcast %cst_28 : f32 to vector<8x128xf32>
    %106 = arith.addf %105, %104 : vector<8x128xf32>
    %107 = arith.divf %105, %106 : vector<8x128xf32>
    %108 = arith.mulf %99, %78 : vector<8x128xf32>
    %109 = arith.mulf %93, %101 : vector<8x128xf32>
    %110 = arith.addf %108, %109 : vector<8x128xf32>
    %111 = math.tanh %110 : vector<8x128xf32>
    %112 = arith.mulf %107, %111 : vector<8x128xf32>
    %113 = arith.addi %4, %c2_i32 : i32
    %c10_i32_29 = arith.constant 10 : i32
    %114 = arith.cmpi slt, %113, %c10_i32_29 : i32
    %115 = arith.select %114, %112, %77 : vector<8x128xf32>
    %116 = arith.select %114, %110, %78 : vector<8x128xf32>
    %117 = arith.index_cast %c2_i32 : i32 to index
    %c0_30 = arith.constant 0 : index
    %c0_31 = arith.constant 0 : index
    %118 = vector.load %arg5[%117, %c0_30, %c0_31] : memref<8x8x128xf32, #tpu.memory_space<vmem>>, vector<1x8x128xf32>
    %119 = vector.shape_cast %118 : vector<1x8x128xf32> to vector<8x128xf32>
    %120 = vector.shape_cast %115 : vector<8x128xf32> to vector<1x8x128xf32>
    tpu.vector_store %arg5[%117, %c0_30, %c0_31], %120 {strides = array<i32>} : memref<8x8x128xf32, #tpu.memory_space<vmem>>, vector<1x8x128xf32>,
    %c3_i32 = arith.constant 3 : i32
    %121 = arith.index_cast %c3_i32 : i32 to index
    %c0_32 = arith.constant 0 : index
    %c0_33 = arith.constant 0 : index
    %122 = vector.load %arg1[%121, %c0_32, %c0_33] : memref<8x8x512xf32, #tpu.memory_space<vmem>>, vector<1x8x512xf32>
    %123 = vector.shape_cast %122 : vector<1x8x512xf32> to vector<8x512xf32>
    %cst_34 = arith.constant dense<0.000000e+00> : vector<8x512xf32>
    %124 = tpu.matmul %115, %3, %cst_34 {dimension_numbers = #tpu.dot_dimension_numbers<[1], [0], [0], [1], [0, 0, 1, 1], [], []>} : vector<8x128xf32>, vector<128x512xf32>, vector<8x512xf32> -> vector<8x512xf32>
    %125 = arith.addf %123, %124 : vector<8x512xf32>
    %126 = vector.extract_strided_slice %125 {offsets = [0, 0], sizes = [8, 128], strides = [1, 1]} : vector<8x512xf32> to vector<8x128xf32>
    %127 = arith.negf %126 : vector<8x128xf32>
    %128 = math.exp %127 : vector<8x128xf32>
    %cst_35 = arith.constant 1.000000e+00 : f32
    %129 = vector.broadcast %cst_35 : f32 to vector<8x128xf32>
    %130 = arith.addf %129, %128 : vector<8x128xf32>
    %131 = arith.divf %129, %130 : vector<8x128xf32>
    %132 = vector.extract_strided_slice %125 {offsets = [0, 128], sizes = [8, 128], strides = [1, 1]} : vector<8x512xf32> to vector<8x128xf32>
    %133 = arith.negf %132 : vector<8x128xf32>
    %134 = math.exp %133 : vector<8x128xf32>
    %cst_36 = arith.constant 1.000000e+00 : f32
    %135 = vector.broadcast %cst_36 : f32 to vector<8x128xf32>
    %136 = arith.addf %135, %134 : vector<8x128xf32>
    %137 = arith.divf %135, %136 : vector<8x128xf32>
    %138 = vector.extract_strided_slice %125 {offsets = [0, 256], sizes = [8, 128], strides = [1, 1]} : vector<8x512xf32> to vector<8x128xf32>
    %139 = math.tanh %138 : vector<8x128xf32>
    %140 = vector.extract_strided_slice %125 {offsets = [0, 384], sizes = [8, 128], strides = [1, 1]} : vector<8x512xf32> to vector<8x128xf32>
    %141 = arith.negf %140 : vector<8x128xf32>
    %142 = math.exp %141 : vector<8x128xf32>
    %cst_37 = arith.constant 1.000000e+00 : f32
    %143 = vector.broadcast %cst_37 : f32 to vector<8x128xf32>
    %144 = arith.addf %143, %142 : vector<8x128xf32>
    %145 = arith.divf %143, %144 : vector<8x128xf32>
    %146 = arith.mulf %137, %116 : vector<8x128xf32>
    %147 = arith.mulf %131, %139 : vector<8x128xf32>
    %148 = arith.addf %146, %147 : vector<8x128xf32>
    %149 = math.tanh %148 : vector<8x128xf32>
    %150 = arith.mulf %145, %149 : vector<8x128xf32>
    %151 = arith.addi %4, %c3_i32 : i32
    %c10_i32_38 = arith.constant 10 : i32
    %152 = arith.cmpi slt, %151, %c10_i32_38 : i32
    %153 = arith.select %152, %150, %115 : vector<8x128xf32>
    %154 = arith.select %152, %148, %116 : vector<8x128xf32>
    %155 = arith.index_cast %c3_i32 : i32 to index
    %c0_39 = arith.constant 0 : index
    %c0_40 = arith.constant 0 : index
    %156 = vector.load %arg5[%155, %c0_39, %c0_40] : memref<8x8x128xf32, #tpu.memory_space<vmem>>, vector<1x8x128xf32>
    %157 = vector.shape_cast %156 : vector<1x8x128xf32> to vector<8x128xf32>
    %158 = vector.shape_cast %153 : vector<8x128xf32> to vector<1x8x128xf32>
    tpu.vector_store %arg5[%155, %c0_39, %c0_40], %158 {strides = array<i32>} : memref<8x8x128xf32, #tpu.memory_space<vmem>>, vector<1x8x128xf32>,
    %c4_i32 = arith.constant 4 : i32
    %159 = arith.index_cast %c4_i32 : i32 to index
    %c0_41 = arith.constant 0 : index
    %c0_42 = arith.constant 0 : index
    %160 = vector.load %arg1[%159, %c0_41, %c0_42] : memref<8x8x512xf32, #tpu.memory_space<vmem>>, vector<1x8x512xf32>
    %161 = vector.shape_cast %160 : vector<1x8x512xf32> to vector<8x512xf32>
    %cst_43 = arith.constant dense<0.000000e+00> : vector<8x512xf32>
    %162 = tpu.matmul %153, %3, %cst_43 {dimension_numbers = #tpu.dot_dimension_numbers<[1], [0], [0], [1], [0, 0, 1, 1], [], []>} : vector<8x128xf32>, vector<128x512xf32>, vector<8x512xf32> -> vector<8x512xf32>
    %163 = arith.addf %161, %162 : vector<8x512xf32>
    %164 = vector.extract_strided_slice %163 {offsets = [0, 0], sizes = [8, 128], strides = [1, 1]} : vector<8x512xf32> to vector<8x128xf32>
    %165 = arith.negf %164 : vector<8x128xf32>
    %166 = math.exp %165 : vector<8x128xf32>
    %cst_44 = arith.constant 1.000000e+00 : f32
    %167 = vector.broadcast %cst_44 : f32 to vector<8x128xf32>
    %168 = arith.addf %167, %166 : vector<8x128xf32>
    %169 = arith.divf %167, %168 : vector<8x128xf32>
    %170 = vector.extract_strided_slice %163 {offsets = [0, 128], sizes = [8, 128], strides = [1, 1]} : vector<8x512xf32> to vector<8x128xf32>
    %171 = arith.negf %170 : vector<8x128xf32>
    %172 = math.exp %171 : vector<8x128xf32>
    %cst_45 = arith.constant 1.000000e+00 : f32
    %173 = vector.broadcast %cst_45 : f32 to vector<8x128xf32>
    %174 = arith.addf %173, %172 : vector<8x128xf32>
    %175 = arith.divf %173, %174 : vector<8x128xf32>
    %176 = vector.extract_strided_slice %163 {offsets = [0, 256], sizes = [8, 128], strides = [1, 1]} : vector<8x512xf32> to vector<8x128xf32>
    %177 = math.tanh %176 : vector<8x128xf32>
    %178 = vector.extract_strided_slice %163 {offsets = [0, 384], sizes = [8, 128], strides = [1, 1]} : vector<8x512xf32> to vector<8x128xf32>
    %179 = arith.negf %178 : vector<8x128xf32>
    %180 = math.exp %179 : vector<8x128xf32>
    %cst_46 = arith.constant 1.000000e+00 : f32
    %181 = vector.broadcast %cst_46 : f32 to vector<8x128xf32>
    %182 = arith.addf %181, %180 : vector<8x128xf32>
    %183 = arith.divf %181, %182 : vector<8x128xf32>
    %184 = arith.mulf %175, %154 : vector<8x128xf32>
    %185 = arith.mulf %169, %177 : vector<8x128xf32>
    %186 = arith.addf %184, %185 : vector<8x128xf32>
    %187 = math.tanh %186 : vector<8x128xf32>
    %188 = arith.mulf %183, %187 : vector<8x128xf32>
    %189 = arith.addi %4, %c4_i32 : i32
    %c10_i32_47 = arith.constant 10 : i32
    %190 = arith.cmpi slt, %189, %c10_i32_47 : i32
    %191 = arith.select %190, %188, %153 : vector<8x128xf32>
    %192 = arith.select %190, %186, %154 : vector<8x128xf32>
    %193 = arith.index_cast %c4_i32 : i32 to index
    %c0_48 = arith.constant 0 : index
    %c0_49 = arith.constant 0 : index
    %194 = vector.load %arg5[%193, %c0_48, %c0_49] : memref<8x8x128xf32, #tpu.memory_space<vmem>>, vector<1x8x128xf32>
    %195 = vector.shape_cast %194 : vector<1x8x128xf32> to vector<8x128xf32>
    %196 = vector.shape_cast %191 : vector<8x128xf32> to vector<1x8x128xf32>
    tpu.vector_store %arg5[%193, %c0_48, %c0_49], %196 {strides = array<i32>} : memref<8x8x128xf32, #tpu.memory_space<vmem>>, vector<1x8x128xf32>,
    %c5_i32 = arith.constant 5 : i32
    %197 = arith.index_cast %c5_i32 : i32 to index
    %c0_50 = arith.constant 0 : index
    %c0_51 = arith.constant 0 : index
    %198 = vector.load %arg1[%197, %c0_50, %c0_51] : memref<8x8x512xf32, #tpu.memory_space<vmem>>, vector<1x8x512xf32>
    %199 = vector.shape_cast %198 : vector<1x8x512xf32> to vector<8x512xf32>
    %cst_52 = arith.constant dense<0.000000e+00> : vector<8x512xf32>
    %200 = tpu.matmul %191, %3, %cst_52 {dimension_numbers = #tpu.dot_dimension_numbers<[1], [0], [0], [1], [0, 0, 1, 1], [], []>} : vector<8x128xf32>, vector<128x512xf32>, vector<8x512xf32> -> vector<8x512xf32>
    %201 = arith.addf %199, %200 : vector<8x512xf32>
    %202 = vector.extract_strided_slice %201 {offsets = [0, 0], sizes = [8, 128], strides = [1, 1]} : vector<8x512xf32> to vector<8x128xf32>
    %203 = arith.negf %202 : vector<8x128xf32>
    %204 = math.exp %203 : vector<8x128xf32>
    %cst_53 = arith.constant 1.000000e+00 : f32
    %205 = vector.broadcast %cst_53 : f32 to vector<8x128xf32>
    %206 = arith.addf %205, %204 : vector<8x128xf32>
    %207 = arith.divf %205, %206 : vector<8x128xf32>
    %208 = vector.extract_strided_slice %201 {offsets = [0, 128], sizes = [8, 128], strides = [1, 1]} : vector<8x512xf32> to vector<8x128xf32>
    %209 = arith.negf %208 : vector<8x128xf32>
    %210 = math.exp %209 : vector<8x128xf32>
    %cst_54 = arith.constant 1.000000e+00 : f32
    %211 = vector.broadcast %cst_54 : f32 to vector<8x128xf32>
    %212 = arith.addf %211, %210 : vector<8x128xf32>
    %213 = arith.divf %211, %212 : vector<8x128xf32>
    %214 = vector.extract_strided_slice %201 {offsets = [0, 256], sizes = [8, 128], strides = [1, 1]} : vector<8x512xf32> to vector<8x128xf32>
    %215 = math.tanh %214 : vector<8x128xf32>
    %216 = vector.extract_strided_slice %201 {offsets = [0, 384], sizes = [8, 128], strides = [1, 1]} : vector<8x512xf32> to vector<8x128xf32>
    %217 = arith.negf %216 : vector<8x128xf32>
    %218 = math.exp %217 : vector<8x128xf32>
    %cst_55 = arith.constant 1.000000e+00 : f32
    %219 = vector.broadcast %cst_55 : f32 to vector<8x128xf32>
    %220 = arith.addf %219, %218 : vector<8x128xf32>
    %221 = arith.divf %219, %220 : vector<8x128xf32>
    %222 = arith.mulf %213, %192 : vector<8x128xf32>
    %223 = arith.mulf %207, %215 : vector<8x128xf32>
    %224 = arith.addf %222, %223 : vector<8x128xf32>
    %225 = math.tanh %224 : vector<8x128xf32>
    %226 = arith.mulf %221, %225 : vector<8x128xf32>
    %227 = arith.addi %4, %c5_i32 : i32
    %c10_i32_56 = arith.constant 10 : i32
    %228 = arith.cmpi slt, %227, %c10_i32_56 : i32
    %229 = arith.select %228, %226, %191 : vector<8x128xf32>
    %230 = arith.select %228, %224, %192 : vector<8x128xf32>
    %231 = arith.index_cast %c5_i32 : i32 to index
    %c0_57 = arith.constant 0 : index
    %c0_58 = arith.constant 0 : index
    %232 = vector.load %arg5[%231, %c0_57, %c0_58] : memref<8x8x128xf32, #tpu.memory_space<vmem>>, vector<1x8x128xf32>
    %233 = vector.shape_cast %232 : vector<1x8x128xf32> to vector<8x128xf32>
    %234 = vector.shape_cast %229 : vector<8x128xf32> to vector<1x8x128xf32>
    tpu.vector_store %arg5[%231, %c0_57, %c0_58], %234 {strides = array<i32>} : memref<8x8x128xf32, #tpu.memory_space<vmem>>, vector<1x8x128xf32>,
    %c6_i32 = arith.constant 6 : i32
    %235 = arith.index_cast %c6_i32 : i32 to index
    %c0_59 = arith.constant 0 : index
    %c0_60 = arith.constant 0 : index
    %236 = vector.load %arg1[%235, %c0_59, %c0_60] : memref<8x8x512xf32, #tpu.memory_space<vmem>>, vector<1x8x512xf32>
    %237 = vector.shape_cast %236 : vector<1x8x512xf32> to vector<8x512xf32>
    %cst_61 = arith.constant dense<0.000000e+00> : vector<8x512xf32>
    %238 = tpu.matmul %229, %3, %cst_61 {dimension_numbers = #tpu.dot_dimension_numbers<[1], [0], [0], [1], [0, 0, 1, 1], [], []>} : vector<8x128xf32>, vector<128x512xf32>, vector<8x512xf32> -> vector<8x512xf32>
    %239 = arith.addf %237, %238 : vector<8x512xf32>
    %240 = vector.extract_strided_slice %239 {offsets = [0, 0], sizes = [8, 128], strides = [1, 1]} : vector<8x512xf32> to vector<8x128xf32>
    %241 = arith.negf %240 : vector<8x128xf32>
    %242 = math.exp %241 : vector<8x128xf32>
    %cst_62 = arith.constant 1.000000e+00 : f32
    %243 = vector.broadcast %cst_62 : f32 to vector<8x128xf32>
    %244 = arith.addf %243, %242 : vector<8x128xf32>
    %245 = arith.divf %243, %244 : vector<8x128xf32>
    %246 = vector.extract_strided_slice %239 {offsets = [0, 128], sizes = [8, 128], strides = [1, 1]} : vector<8x512xf32> to vector<8x128xf32>
    %247 = arith.negf %246 : vector<8x128xf32>
    %248 = math.exp %247 : vector<8x128xf32>
    %cst_63 = arith.constant 1.000000e+00 : f32
    %249 = vector.broadcast %cst_63 : f32 to vector<8x128xf32>
    %250 = arith.addf %249, %248 : vector<8x128xf32>
    %251 = arith.divf %249, %250 : vector<8x128xf32>
    %252 = vector.extract_strided_slice %239 {offsets = [0, 256], sizes = [8, 128], strides = [1, 1]} : vector<8x512xf32> to vector<8x128xf32>
    %253 = math.tanh %252 : vector<8x128xf32>
    %254 = vector.extract_strided_slice %239 {offsets = [0, 384], sizes = [8, 128], strides = [1, 1]} : vector<8x512xf32> to vector<8x128xf32>
    %255 = arith.negf %254 : vector<8x128xf32>
    %256 = math.exp %255 : vector<8x128xf32>
    %cst_64 = arith.constant 1.000000e+00 : f32
    %257 = vector.broadcast %cst_64 : f32 to vector<8x128xf32>
    %258 = arith.addf %257, %256 : vector<8x128xf32>
    %259 = arith.divf %257, %258 : vector<8x128xf32>
    %260 = arith.mulf %251, %230 : vector<8x128xf32>
    %261 = arith.mulf %245, %253 : vector<8x128xf32>
    %262 = arith.addf %260, %261 : vector<8x128xf32>
    %263 = math.tanh %262 : vector<8x128xf32>
    %264 = arith.mulf %259, %263 : vector<8x128xf32>
    %265 = arith.addi %4, %c6_i32 : i32
    %c10_i32_65 = arith.constant 10 : i32
    %266 = arith.cmpi slt, %265, %c10_i32_65 : i32
    %267 = arith.select %266, %264, %229 : vector<8x128xf32>
    %268 = arith.select %266, %262, %230 : vector<8x128xf32>
    %269 = arith.index_cast %c6_i32 : i32 to index
    %c0_66 = arith.constant 0 : index
    %c0_67 = arith.constant 0 : index
    %270 = vector.load %arg5[%269, %c0_66, %c0_67] : memref<8x8x128xf32, #tpu.memory_space<vmem>>, vector<1x8x128xf32>
    %271 = vector.shape_cast %270 : vector<1x8x128xf32> to vector<8x128xf32>
    %272 = vector.shape_cast %267 : vector<8x128xf32> to vector<1x8x128xf32>
    tpu.vector_store %arg5[%269, %c0_66, %c0_67], %272 {strides = array<i32>} : memref<8x8x128xf32, #tpu.memory_space<vmem>>, vector<1x8x128xf32>,
    %c7_i32 = arith.constant 7 : i32
    %273 = arith.index_cast %c7_i32 : i32 to index
    %c0_68 = arith.constant 0 : index
    %c0_69 = arith.constant 0 : index
    %274 = vector.load %arg1[%273, %c0_68, %c0_69] : memref<8x8x512xf32, #tpu.memory_space<vmem>>, vector<1x8x512xf32>
    %275 = vector.shape_cast %274 : vector<1x8x512xf32> to vector<8x512xf32>
    %cst_70 = arith.constant dense<0.000000e+00> : vector<8x512xf32>
    %276 = tpu.matmul %267, %3, %cst_70 {dimension_numbers = #tpu.dot_dimension_numbers<[1], [0], [0], [1], [0, 0, 1, 1], [], []>} : vector<8x128xf32>, vector<128x512xf32>, vector<8x512xf32> -> vector<8x512xf32>
    %277 = arith.addf %275, %276 : vector<8x512xf32>
    %278 = vector.extract_strided_slice %277 {offsets = [0, 0], sizes = [8, 128], strides = [1, 1]} : vector<8x512xf32> to vector<8x128xf32>
    %279 = arith.negf %278 : vector<8x128xf32>
    %280 = math.exp %279 : vector<8x128xf32>
    %cst_71 = arith.constant 1.000000e+00 : f32
    %281 = vector.broadcast %cst_71 : f32 to vector<8x128xf32>
    %282 = arith.addf %281, %280 : vector<8x128xf32>
    %283 = arith.divf %281, %282 : vector<8x128xf32>
    %284 = vector.extract_strided_slice %277 {offsets = [0, 128], sizes = [8, 128], strides = [1, 1]} : vector<8x512xf32> to vector<8x128xf32>
    %285 = arith.negf %284 : vector<8x128xf32>
    %286 = math.exp %285 : vector<8x128xf32>
    %cst_72 = arith.constant 1.000000e+00 : f32
    %287 = vector.broadcast %cst_72 : f32 to vector<8x128xf32>
    %288 = arith.addf %287, %286 : vector<8x128xf32>
    %289 = arith.divf %287, %288 : vector<8x128xf32>
    %290 = vector.extract_strided_slice %277 {offsets = [0, 256], sizes = [8, 128], strides = [1, 1]} : vector<8x512xf32> to vector<8x128xf32>
    %291 = math.tanh %290 : vector<8x128xf32>
    %292 = vector.extract_strided_slice %277 {offsets = [0, 384], sizes = [8, 128], strides = [1, 1]} : vector<8x512xf32> to vector<8x128xf32>
    %293 = arith.negf %292 : vector<8x128xf32>
    %294 = math.exp %293 : vector<8x128xf32>
    %cst_73 = arith.constant 1.000000e+00 : f32
    %295 = vector.broadcast %cst_73 : f32 to vector<8x128xf32>
    %296 = arith.addf %295, %294 : vector<8x128xf32>
    %297 = arith.divf %295, %296 : vector<8x128xf32>
    %298 = arith.mulf %289, %268 : vector<8x128xf32>
    %299 = arith.mulf %283, %291 : vector<8x128xf32>
    %300 = arith.addf %298, %299 : vector<8x128xf32>
    %301 = math.tanh %300 : vector<8x128xf32>
    %302 = arith.mulf %297, %301 : vector<8x128xf32>
    %303 = arith.addi %4, %c7_i32 : i32
    %c10_i32_74 = arith.constant 10 : i32
    %304 = arith.cmpi slt, %303, %c10_i32_74 : i32
    %305 = arith.select %304, %302, %267 : vector<8x128xf32>
    %306 = arith.select %304, %300, %268 : vector<8x128xf32>
    %307 = arith.index_cast %c7_i32 : i32 to index
    %c0_75 = arith.constant 0 : index
    %c0_76 = arith.constant 0 : index
    %308 = vector.load %arg5[%307, %c0_75, %c0_76] : memref<8x8x128xf32, #tpu.memory_space<vmem>>, vector<1x8x128xf32>
    %309 = vector.shape_cast %308 : vector<1x8x128xf32> to vector<8x128xf32>
    %310 = vector.shape_cast %305 : vector<8x128xf32> to vector<1x8x128xf32>
    tpu.vector_store %arg5[%307, %c0_75, %c0_76], %310 {strides = array<i32>} : memref<8x8x128xf32, #tpu.memory_space<vmem>>, vector<1x8x128xf32>,
    %c8_i32_77 = arith.constant 8 : i32
    %c0_78 = arith.constant 0 : index
    %c0_79 = arith.constant 0 : index
    %311 = vector.load %arg6[%c0_78, %c0_79] : memref<8x128xf32, #tpu.memory_space<vmem>>, vector<8x128xf32>
    tpu.vector_store %arg6[%c0_78, %c0_79], %305 {strides = array<i32>} : memref<8x128xf32, #tpu.memory_space<vmem>>, vector<8x128xf32>,
    %c0_80 = arith.constant 0 : index
    %c0_81 = arith.constant 0 : index
    %312 = vector.load %arg7[%c0_80, %c0_81] : memref<8x128xf32, #tpu.memory_space<vmem>>, vector<8x128xf32>
    tpu.vector_store %arg7[%c0_80, %c0_81], %306 {strides = array<i32>} : memref<8x128xf32, #tpu.memory_space<vmem>>, vector<8x128xf32>,
    return
  }
  func.func @transform_0(%arg0: i32) -> (i32, i32, i32) {
    %c0_i32 = arith.constant 0 : i32
    %c0_i32_0 = arith.constant 0 : i32
    %c0_i32_1 = arith.constant 0 : i32
    return %arg0, %c0_i32, %c0_i32_0 : i32, i32, i32
  }
  func.func @transform_1(%arg0: i32) -> (i32, i32) {
    %c0_i32 = arith.constant 0 : i32
    %c0_i32_0 = arith.constant 0 : i32
    %c0_i32_1 = arith.constant 0 : i32
    return %c0_i32, %c0_i32_0 : i32, i32
  }
  func.func @transform_2(%arg0: i32) -> (i32, i32) {
    %c0_i32 = arith.constant 0 : i32
    %c0_i32_0 = arith.constant 0 : i32
    %c0_i32_1 = arith.constant 0 : i32
    return %c0_i32, %c0_i32_0 : i32, i32
  }
  func.func @transform_3(%arg0: i32) -> (i32, i32) {
    %c0_i32 = arith.constant 0 : i32
    %c0_i32_0 = arith.constant 0 : i32
    %c0_i32_1 = arith.constant 0 : i32
    return %c0_i32, %c0_i32_0 : i32, i32
  }
  func.func @transform_4(%arg0: i32) -> (i32, i32, i32) {
    %c0_i32 = arith.constant 0 : i32
    %c0_i32_0 = arith.constant 0 : i32
    %c0_i32_1 = arith.constant 0 : i32
    return %arg0, %c0_i32, %c0_i32_0 : i32, i32, i32
  }
  func.func @transform_5(%arg0: i32) -> (i32, i32) {
    %c0_i32 = arith.constant 0 : i32
    %c0_i32_0 = arith.constant 0 : i32
    %c0_i32_1 = arith.constant 0 : i32
    return %c0_i32, %c0_i32_0 : i32, i32
  }
  func.func @transform_6(%arg0: i32) -> (i32, i32) {
    %c0_i32 = arith.constant 0 : i32
    %c0_i32_0 = arith.constant 0 : i32
    %c0_i32_1 = arith.constant 0 : i32
    return %c0_i32, %c0_i32_0 : i32, i32
  }
}

</mosaic_0001>

<bundles_post_ra>
// kernel: tpu_custom_call.1
= control target key start
LH: loop header
LB: loop body
LE: loop exit
PB: predicated region body
PF: predicated region fallthrough
CT: control target
= control target key end

     0   :  { %s3694_s0 = inlined_call_operand.hbm [shape: f32[16,8,512], index: 0, kind: input, shape index: {}]   ;;  %s3695_s1 = inlined_call_operand.hbm [shape: f32[128,512], index: 1, kind: input, shape index: {}]   ;;  %s3696_s2 = inlined_call_operand.hbm [shape: f32[8,128], index: 2, kind: input, shape index: {}]   ;;  %s3697_s3 = inlined_call_operand.hbm [shape: f32[8,128], index: 3, kind: input, shape index: {}]   ;;  %s3698_s4 = inlined_call_operand.hbm [shape: f32[16,8,128], index: 4, kind: output, shape index: {0}]   ;;  %s3699_s5 = inlined_call_operand.hbm [shape: f32[8,128], index: 5, kind: output, shape index: {1}]   ;;  %s3700_s6 = inlined_call_operand.hbm [shape: f32[8,128], index: 6, kind: output, shape index: {2}]  }
   0x1   :  { %3814 = sst [smem:[#allocation48_spill]] %s3694_s0 }
   0x2   :  { %12 = vsyncpa [#allocation3], 0 }
   0x3   :  { %14 = vsyncpa [#allocation3 + $0x1], 0 }
   0x4   :  { %15 = vsyncpa [#allocation6], 0 }
   0x5   :  { %16 = vsyncpa [#allocation9], 0 }
   0x6   :  { %17 = vsyncpa [#allocation4], 0 }
   0x7   :  { %19 = vsyncpa [#allocation4 + $0x1], 0 }
   0x8   :  { %20 = vsyncpa [#allocation12], 0  ;;  %s2520_s21 = smov 0   ;;  %s2522_s22 = smov 0  }
   0x9   :  { %s2524_s23 = smov 0   ;;  %s2526_s24 = smov 0  }
   0xa LB: > { %s2541_s25 = sadd.s32 4294967295, %s2474_s24   ;;  %s1844_s26 = sadd.s32 4294967294, %s2474_s24   ;;  %s2474_s24 = sphi %s2526_s24, %s4007_s24   ;;  %s2470_s23 = sphi %s2524_s23, %s4006_s23   ;;  %s2466_s22 = sphi %s2522_s22, %s4005_s22   ;;  %s2462_s21 = sphi %s2520_s21, %s4004_s21  }
   0xb   : > { %p46_p0 = scmp.ne.s32.totalorder %s2466_s22, %s2462_s21  ;;  %p47_p1 = scmp.eq.s32.totalorder %s2541_s25, 0 }
   0xc   : > { %p3703_p2 = scmp.eq.s32.totalorder %s2541_s25, 1  ;;  %p139_p3 = scmp.eq.s32.totalorder %s1844_s26, 1 }
   0xd   : > { %p2550_p4 = por %p47_p1, %p46_p0  ;;  %p1845_p5 = scmp.ge.s32.totalorder %s2474_s24, 1 }
   0xe   : > { %p2555_p6 = por %p139_p3, %p46_p0  ;;  %p188_p7 = scmp.lt.s32.totalorder %s2474_s24, 3 }
   0xf   : > { %s199_s7 = sshll.u32 %s3695_s1, 4  ;;  %s2476_s9 = smov [#allocation5]   ;;  %s200_s7 = int_to_ptr.hbm [resolvable:$true] %s199_s7 }
  0x10   : > { %p2564_p9 = pnand %p1845_p5, %p188_p7  ;;  %s201_s10 = sshll.u32 %s2476_s9, 4  ;;  %s202_s10 = int_to_ptr.vmem [resolvable:$true] %s201_s10 }
  0x11   : > { %s214_s14 = sshll.u32 %s3696_s2, 4  ;;  %s3701_s15 = smov 512   ;;  %s215_s14 = int_to_ptr.hbm [resolvable:$true] %s214_s14 }
  0x12   : > { %p1957_p10 = pneg %p2564_p9  ;;  %s3702_s16 = smov 32  }
  0x13   : > { %s2479_s17 = smov [#allocation7]   ;;  %s226_s26 = sshll.u32 %s3697_s3, 4  ;;  %s227_s26 = int_to_ptr.hbm [resolvable:$true] %s226_s26 }
  0x14   : > { %p2572_p11 = pnand %p1957_p10, %p47_p1  ;;  %s216_s18 = sshll.u32 %s2479_s17, 4  ;;  %s217_s18 = int_to_ptr.vmem [resolvable:$true] %s216_s18 }
  0x15   : > { %s2480_s29 = smov [#allocation8]   ;;  %p40_p0 = scmp.ne.s32.totalorder %s2470_s23, %s2466_s22 }
  0x16   : > { %1960 = dma.hbm_to_vmem [thread:$0]  (!%p2572_p11), %s200_s7, 8192, %s202_s10, [#allocation6], %s3701_s15, %s3701_s15, %s3702_s16  }
  0x17   : > { %1963 = dma.hbm_to_vmem [thread:$0]  (!%p2572_p11), %s215_s14, 128, %s217_s18, [#allocation6]  }
  0x18   : > { %s228_s30 = sshll.u32 %s2480_s29, 4  ;;  %s2591_s7 = sadd.s32 1, %s2474_s24   ;;  %s229_s30 = int_to_ptr.vmem [resolvable:$true] %s228_s30 }
  0x19   : > { %1966 = dma.hbm_to_vmem [thread:$0]  (!%p2572_p11), %s227_s26, 128, %s229_s30, [#allocation9]  }
  0x1a   : > { %s30_s9 = ssub.s32 %s2474_s24, %s2591_s7  ;;  %s33_s10 = sadd.s32 1, %s2470_s23 }
  0x1b   : > { %p31_p13 = scmp.eq.s32.totalorder %s30_s9, 0  ;;  %p41_p3 = scmp.eq.s32.totalorder %s2474_s24, 0 }
  0x1c   : > { %p2606_p5 = por %p3703_p2, %p40_p0  ;;  %p1978_p7 = scmp.lt.s32.totalorder %s2474_s24, 2 }
  0x1d   : > { %s2602_s12 = scalar_select %p31_p13, %s2470_s23, %s33_s10  }
  0x1e   : > { %s239_s14 = sand.u32 1, %s2470_s23   ;;  %s1931_s17 = sshll.u32 %s2474_s24, 8 }
  0x1f   : > { %p42_p10 = por %p41_p3, %p40_p0  ;;  %s1850_s18 = sshll.u32 %s239_s14, 8 }
  0x20   : > { %s3820_s0 = sld [smem:[#allocation48_spill]]  ;;  %s243_s29 = scalar_lea.vmem [#allocation2], %s1850_s18 }
  0x21   : > { %s252_s30 = sshll.u32 %s243_s29, 4  ;;  %p2616_p11 = pnand %p1978_p7, %p42_p10  ;;  %s253_s30 = int_to_ptr.vmem [resolvable:$true] %s252_s30 }
  0x22   : > { %s240_s10 = scalar_lea.sflag [#allocation3], %s239_s14 }
  0x23   : > { %p2314_p0 = pneg %p2616_p11 }
  0x26   : > { %s249_s20 = scalar_lea.hbm %s3820_s0, %s1931_s17  ;;  %s2317_s18 = scalar_lea.hbm %s3820_s0, 512 }
  0x27   : > { %s250_s26 = sshll.u32 %s249_s20, 4  ;;  %s251_s26 = int_to_ptr.hbm [resolvable:$true] %s250_s26 }
  0x28   : > { %s2310_s15 = sshra.s32 %s251_s26, 4  ;;  %s2311_s15 = int_to_ptr.hbm [resolvable:$true] %s2310_s15 }
  0x29   : > { %s2312_s16 = scalar_lea.hbm %s2311_s15, 256  ;;  %p2318_p7 = scmp.lt.s32.totalorder %s2311_s15, %s3820_s0 }
  0x2a   : > { %p2313_p13 = scmp.ne.s32.totalorder %s2311_s15, %s2312_s16  ;;  %p2319_p10 = scmp.lt.s32.totalorder %s2317_s18, %s2312_s16 }
  0x2c   : > { %p2315_p3 = pnand %p2314_p0, %p2313_p13  ;;  %p2320_p2 = por %p2319_p10, %p2318_p7 }
  0x2e   : > { %p2316_p12 = pneg %p2315_p3 }
  0x30   : > { %p2321_p8 = pnand %p2320_p2, %p2316_p12 }
  0x32   : > { %2324 = shalt.err (!%p2321_p8)
}
  0x33   : > { %s3822_s14 = smov 32   ;;  %s3823_s29 = smov 512  }
  0x34   : > { %1970 = dma.hbm_to_vmem [thread:$0]  (!%p2616_p11), %s251_s26, 4096, %s253_s30, %s240_s10, %s3823_s29, %s3823_s29, %s3822_s14  }
  0x35   : > { %264 = sbr.rel (%p2564_p9) target bundleno = 1490 (0x5d2), region = 36 }
  0x3a   : > { %s2636_s17 = sand.u32 1, %s2466_s22  }
  0x3b   : > { %s1855_s15 = sshll.u32 %s2636_s17, 8  ;;  %s267_s16 = scalar_lea.sflag [#allocation3], %s2636_s17 }
  0x3c   : > { %s2640_s11 = scalar_lea.vmem [#allocation2], %s1855_s15 }
  0x3d   : > { %2441 = dma.done.wait (%p2550_p4), %s267_s16, 4096  }
  0x3e   : > { %2443 = vsyncadd (%p2550_p4), %s267_s16, 4294963200 }
  0x3f   : > { %2445 = dma.done.wait (%p47_p1), [#allocation6], 8320  }
  0x40   : > { %2447 = vsyncadd (%p47_p1), [#allocation6], 4294958976 }
  0x41   : > { %2449 = dma.done.wait (%p47_p1), [#allocation9], 128  }
  0x42   : > { %2451 = vsyncadd (%p47_p1), [#allocation9], 4294967168  ;;  %s1859_s8 = sshll.u32 %s2636_s17, 6  ;;  %p3824_p2 = scmp.ne.s32.totalorder %s2541_s25, 0 }
  0x43   : > { %s2655_s26 = scalar_lea.vmem [#allocation10], %s1859_s8 }
  0x44   : > { %320 = sbr.rel (%p3824_p2) target bundleno = 76 (0x4c), region = 56 }
  0x49   : > { %v321_v0 = vld [vmem:[#allocation7] sm:$0xff]  ;;  %v323_v1 = vld [vmem:[#allocation8] sm:$0xff] }
  0x4a   : > { %322 = vst [vmem:[#allocation11] sm:$0xff] %v321_v0 }
  0x4b   : > { %324 = vst [vmem:[#allocation13] sm:$0xff] %v323_v1 }
  0x4c PF: > { %v2659_v2 = vld [vmem:[#allocation5 + $0x1e0] sm:$0xff]  ;;  %v2661_v3 = vld [vmem:[#allocation5 + $0x1e8] sm:$0xff]  ;;  %v2663_v4 = vld [vmem:[#allocation5 + $0x1f8] sm:$0xff]  ;;  %s2990_s27 = sshll.u32 %s2541_s25, 3 }
  0x4d   : > { %3825 = vst [vmem:[#allocation19_spill] sm:$0xff] %v2659_v2  ;;  %396 = vmatpush.msra.mxu0 %v2659_v2  ;;  %416 = vmatpush.msra.mxu1 %v2661_v3  ;;  %v2667_v5 = vld [vmem:[#allocation5 + $0x1c0] sm:$0xff]  ;;  %v2669_v6 = vld [vmem:[#allocation5 + $0x1c8] sm:$0xff]  ;;  %v2671_v7 = vld [vmem:[#allocation5 + $0x1d8] sm:$0xff]  ;;  %p543_p1 = scmp.lt.s32.totalorder %s2990_s27, 10  ;;  %s702_s9 = sadd.s32 1, %s2990_s27 }
  0x4e   : > { %456 = vmatpush.msra.mxu3 %v2663_v4  ;;  %v2674_v8 = vld [vmem:[#allocation5 + $0x1a0] sm:$0xff]  ;;  %v2676_v9 = vld [vmem:[#allocation5 + $0x1a8] sm:$0xff]  ;;  %v2680_v10 = vld [vmem:[#allocation5 + $0x1b8] sm:$0xff]  ;;  %p3081_p4 = scmp.lt.s32.totalorder %s702_s9, 10  ;;  %s863_s19 = sadd.s32 2, %s2990_s27 }
  0x4f   : > { %397 = vmatpush.msra.mxu0 %v2667_v5  ;;  %417 = vmatpush.msra.mxu1 %v2669_v6  ;;  %v2683_v11 = vld [vmem:[#allocation5 + $0x180] sm:$0xff]  ;;  %v2685_v12 = vld [vmem:[#allocation5 + $0x188] sm:$0xff]  ;;  %v2689_v13 = vld [vmem:[#allocation5 + $0x198] sm:$0xff]  ;;  %s544_s30 = scalar_select %p543_p1, 1, 0 }
  0x50   : > { %457 = vmatpush.msra.mxu3 %v2671_v7  ;;  %v2692_v14 = vld [vmem:[#allocation5 + $0x160] sm:$0xff]  ;;  %v2694_v15 = vld [vmem:[#allocation5 + $0x168] sm:$0xff]  ;;  %v2698_v16 = vld [vmem:[#allocation5 + $0x178] sm:$0xff]  ;;  %s704_s18 = scalar_select %p3081_p4, 1, 0 }
  0x51   : > { %398 = vmatpush.msra.mxu0 %v2674_v8  ;;  %418 = vmatpush.msra.mxu1 %v2676_v9  ;;  %v2701_v17 = vld [vmem:[#allocation5 + $0x140] sm:$0xff]  ;;  %v2703_v18 = vld [vmem:[#allocation5 + $0x148] sm:$0xff]  ;;  %v2705_v19 = vld [vmem:[#allocation5 + $0x1f0] sm:$0xff]  ;;  %p3171_p8 = scmp.lt.s32.totalorder %s863_s19, 10  ;;  %s1024_s29 = sadd.s32 3, %s2990_s27 }
  0x52   : > { %458 = vmatpush.msra.mxu3 %v2680_v10  ;;  %v2709_v20 = vld [vmem:[#allocation5 + $0x158] sm:$0xff]  ;;  %v2711_v21 = vld [vmem:[#allocation5 + $0x1d0] sm:$0xff]  ;;  %v2714_v22 = vld [vmem:[#allocation5 + $0x120] sm:$0xff]  ;;  %436 = vmatpush.msra.mxu2 %v2705_v19  ;;  %p3389_p9 = scmp.lt.s32.totalorder %s1024_s29, 10  ;;  %s1185_s8 = sadd.s32 4, %s2990_s27 }
  0x53   : > { %399 = vmatpush.msra.mxu0 %v2683_v11  ;;  %419 = vmatpush.msra.mxu1 %v2685_v12  ;;  %v2716_v23 = vld [vmem:[#allocation5 + $0x128] sm:$0xff]  ;;  %v2721_v24 = vld [vmem:[#allocation5 + $0x138] sm:$0xff]  ;;  %v2723_v25 = vld [vmem:[#allocation5 + $0x1b0] sm:$0xff]  ;;  %s865_s14 = scalar_select %p3171_p8, 1, 0 }
  0x54   : > { %459 = vmatpush.msra.mxu3 %v2689_v13  ;;  %v2726_v26 = vld [vmem:[#allocation5 + $0x100] sm:$0xff]  ;;  %v2728_v27 = vld [vmem:[#allocation5 + $0x108] sm:$0xff]  ;;  %437 = vmatpush.msra.mxu2 %v2711_v21  ;;  %v2733_v28 = vld [vmem:[#allocation5 + $0x118] sm:$0xff]  ;;  %s1026_s16 = scalar_select %p3389_p9, 1, 0 }
  0x55   : > { %400 = vmatpush.msra.mxu0 %v2692_v14  ;;  %420 = vmatpush.msra.mxu1 %v2694_v15  ;;  %v2735_v29 = vld [vmem:[#allocation5 + $0x190] sm:$0xff]  ;;  %v2738_v30 = vld [vmem:[#allocation5 + $0xe0] sm:$0xff]  ;;  %v2740_v31 = vld [vmem:[#allocation5 + $0xe8] sm:$0xff]  ;;  %p3479_p12 = scmp.lt.s32.totalorder %s1185_s8, 10  ;;  %s1346_s10 = sadd.s32 5, %s2990_s27 }
  0x56   : > { %460 = vmatpush.msra.mxu3 %v2698_v16  ;;  %438 = vmatpush.msra.mxu2 %v2723_v25  ;;  %v2745_v32 = vld [vmem:[#allocation5 + $0xf8] sm:$0xff]  ;;  %v2747_v33 = vld [vmem:[#allocation5 + $0x170] sm:$0xff]  ;;  %v2750_v34 = vld [vmem:[#allocation5 + $0xc0] sm:$0xff]  ;;  %p3569_p11 = scmp.lt.s32.totalorder %s1346_s10, 10  ;;  %s1507_s20 = sadd.s32 6, %s2990_s27 }
  0x57   : > { %401 = vmatpush.msra.mxu0 %v2701_v17  ;;  %421 = vmatpush.msra.mxu1 %v2703_v18  ;;  %v2752_v35 = vld [vmem:[#allocation5 + $0xc8] sm:$0xff]  ;;  %v2757_v36 = vld [vmem:[#allocation5 + $0xd8] sm:$0xff]  ;;  %v2759_v37 = vld [vmem:[#allocation5 + $0x150] sm:$0xff]  ;;  %s1187_s9 = scalar_select %p3479_p12, 1, 0 }
  0x58   : > { %461 = vmatpush.msra.mxu3 %v2709_v20  ;;  %3826 = vst [vmem:[#allocation20_spill] sm:$0xff] %v2752_v35  ;;  %439 = vmatpush.msra.mxu2 %v2735_v29  ;;  %v2762_v38 = vld [vmem:[#allocation5 + $0xa0] sm:$0xff]  ;;  %v2764_v39 = vld [vmem:[#allocation5 + $0xa8] sm:$0xff]  ;;  %v2769_v40 = vld [vmem:[#allocation5 + $0xb8] sm:$0xff]  ;;  %s1348_s19 = scalar_select %p3569_p11, 1, 0 }
  0x59   : > { %402 = vmatpush.msra.mxu0 %v2714_v22  ;;  %422 = vmatpush.msra.mxu1 %v2716_v23  ;;  %3827 = vst [vmem:[#allocation21_spill] sm:$0xff] %v2757_v36  ;;  %v2771_v41 = vld [vmem:[#allocation5 + $0x130] sm:$0xff]  ;;  %v2774_v42 = vld [vmem:[#allocation5 + $0x80] sm:$0xff]  ;;  %v2776_v43 = vld [vmem:[#allocation5 + $0x88] sm:$0xff]  ;;  %p3595_p13 = scmp.lt.s32.totalorder %s1507_s20, 10  ;;  %s1668_s15 = sadd.s32 7, %s2990_s27 }
  0x5a   : > { %462 = vmatpush.msra.mxu3 %v2721_v24  ;;  %3828 = vst [vmem:[#allocation22_spill] sm:$0xff] %v2762_v38  ;;  %440 = vmatpush.msra.mxu2 %v2747_v33  ;;  %v2781_v44 = vld [vmem:[#allocation5 + $0x98] sm:$0xff]  ;;  %v2783_v45 = vld [vmem:[#allocation5 + $0x110] sm:$0xff]  ;;  %v2786_v46 = vld [vmem:[#allocation5 + $0x60] sm:$0xff]  ;;  %p3621_p0 = scmp.lt.s32.totalorder %s1668_s15, 10  ;;  %s1932_s27 = sshll.u32 %s2541_s25, 6 }
  0x5b   : > { %403 = vmatpush.msra.mxu0 %v2726_v26  ;;  %423 = vmatpush.msra.mxu1 %v2728_v27  ;;  %3829 = vst [vmem:[#allocation23_spill] sm:$0xff] %v2764_v39  ;;  %v2788_v47 = vld [vmem:[#allocation5 + $0x68] sm:$0xff]  ;;  %v2793_v48 = vld [vmem:[#allocation5 + $0x78] sm:$0xff]  ;;  %v2795_v49 = vld [vmem:[#allocation5 + $0xf0] sm:$0xff]  ;;  %s1509_s29 = scalar_select %p3595_p13, 1, 0 }
  0x5c   : > { %463 = vmatpush.msra.mxu3 %v2733_v28  ;;  %3830 = vst [vmem:[#allocation24_spill] sm:$0xff] %v2769_v40  ;;  %441 = vmatpush.msra.mxu2 %v2759_v37  ;;  %v2798_v50 = vld [vmem:[#allocation5 + $0x40] sm:$0xff]  ;;  %v2800_v51 = vld [vmem:[#allocation5 + $0x48] sm:$0xff]  ;;  %v2805_v52 = vld [vmem:[#allocation5 + $0x58] sm:$0xff]  ;;  %s1692_s10 = sshll.u32 %s2655_s26, 4  ;;  %s1709_s15 = sshll.u32 %s3699_s5, 4  ;;  %s3640_s10 = int_to_ptr.vmem [resolvable:$true] %s1692_s10  ;;  %s1710_s15 = int_to_ptr.hbm [resolvable:$true] %s1709_s15 }
  0x5d   : > { %404 = vmatpush.msra.mxu0 %v2738_v30  ;;  %424 = vmatpush.msra.mxu1 %v2740_v31  ;;  %3831 = vst [vmem:[#allocation25_spill] sm:$0xff] %v2774_v42  ;;  %v2807_v53 = vld [vmem:[#allocation5 + $0xd0] sm:$0xff]  ;;  %v2810_v54 = vld [vmem:[#allocation5 + $0x20] sm:$0xff]  ;;  %v2812_v55 = vld [vmem:[#allocation5 + $0x28] sm:$0xff] }
  0x5e   : > { %464 = vmatpush.msra.mxu3 %v2745_v32  ;;  %3832 = vst [vmem:[#allocation26_spill] sm:$0xff] %v2776_v43  ;;  %442 = vmatpush.msra.mxu2 %v2771_v41  ;;  %v2817_v56 = vld [vmem:[#allocation5 + $0x38] sm:$0xff]  ;;  %v2819_v57 = vld [vmem:[#allocation5 + $0xb0] sm:$0xff]  ;;  %v2822_v58 = vld [vmem:[#allocation5] sm:$0xff] }
  0x5f   : > { %405 = vmatpush.msra.mxu0 %v2750_v34  ;;  %425 = vmatpush.msra.mxu1 %v2752_v35  ;;  %3833 = vst [vmem:[#allocation27_spill] sm:$0xff] %v2781_v44  ;;  %v2824_v59 = vld [vmem:[#allocation5 + $0x8] sm:$0xff]  ;;  %v2829_v60 = vld [vmem:[#allocation5 + $0x18] sm:$0xff]  ;;  %v2831_v61 = vld [vmem:[#allocation11] sm:$0xff] }
  0x60   : > { %465 = vmatpush.msra.mxu3 %v2757_v36  ;;  %3834 = vst [vmem:[#allocation28_spill] sm:$0xff] %v2786_v46  ;;  %443 = vmatpush.msra.mxu2 %v2783_v45  ;;  %v2837_v62 = vld [vmem:[#allocation5 + $0x90] sm:$0xff] }
  0x61   : > { %406 = vmatpush.msra.mxu0 %v2762_v38  ;;  %426 = vmatpush.msra.mxu1 %v2764_v39  ;;  %3835 = vst [vmem:[#allocation29_spill] sm:$0xff] %v2788_v47  ;;  %v2843_v63 = vld [vmem:[#allocation5 + $0x70] sm:$0xff] }
  0x62   : > { %466 = vmatpush.msra.mxu3 %v2769_v40  ;;  %3836 = vst [vmem:[#allocation30_spill] sm:$0xff] %v2793_v48  ;;  %444 = vmatpush.msra.mxu2 %v2795_v49  ;;  %v2847_v0 = vld [vmem:[#allocation5 + $0x50] sm:$0xff] }
  0x63   : > { %407 = vmatpush.msra.mxu0 %v2774_v42  ;;  %427 = vmatpush.msra.mxu1 %v2776_v43  ;;  %3837 = vst [vmem:[#allocation31_spill] sm:$0xff] %v2798_v50  ;;  %v2853_v1 = vld [vmem:[#allocation5 + $0x30] sm:$0xff] }
  0x64   : > { %467 = vmatpush.msra.mxu3 %v2781_v44  ;;  %3838 = vst [vmem:[#allocation32_spill] sm:$0xff] %v2800_v51  ;;  %445 = vmatpush.msra.mxu2 %v2807_v53 }
  0x65   : > { %408 = vmatpush.msra.mxu0 %v2786_v46  ;;  %428 = vmatpush.msra.mxu1 %v2788_v47  ;;  %3839 = vst [vmem:[#allocation33_spill] sm:$0xff] %v2805_v52 }
  0x66   : > { %3840 = vst [vmem:[#allocation34_spill] sm:$0xff] %v2807_v53  ;;  %468 = vmatpush.msra.mxu3 %v2793_v48  ;;  %446 = vmatpush.msra.mxu2 %v2819_v57 }
  0x67   : > { %3841 = vst [vmem:[#allocation35_spill] sm:$0xff] %v2810_v54  ;;  %409 = vmatpush.msra.mxu0 %v2798_v50  ;;  %429 = vmatpush.msra.mxu1 %v2800_v51 }
  0x68   : > { %3842 = vst [vmem:[#allocation36_spill] sm:$0xff] %v2812_v55  ;;  %469 = vmatpush.msra.mxu3 %v2805_v52  ;;  %447 = vmatpush.msra.mxu2 %v2837_v62 }
  0x69   : > { %3843 = vst [vmem:[#allocation37_spill] sm:$0xff] %v2817_v56  ;;  %410 = vmatpush.msra.mxu0 %v2810_v54  ;;  %430 = vmatpush.msra.mxu1 %v2812_v55 }
  0x6a   : > { %3844 = vst [vmem:[#allocation38_spill] sm:$0xff] %v2819_v57  ;;  %470 = vmatpush.msra.mxu3 %v2817_v56  ;;  %448 = vmatpush.msra.mxu2 %v2843_v63 }
  0x6b   : > { %3845 = vst [vmem:[#allocation39_spill] sm:$0xff] %v2822_v58  ;;  %411 = vmatpush.msra.mxu0 %v2822_v58  ;;  %431 = vmatpush.msra.mxu1 %v2824_v59 }
  0x6c   : > { %3846 = vst [vmem:[#allocation40_spill] sm:$0xff] %v2824_v59  ;;  %471 = vmatpush.msra.mxu3 %v2829_v60  ;;  %412 = vmatmul.f32.vlgmr.msra.gmra.mxu0 %v2831_v61 }
  0x6d   : > { %3847 = vst [vmem:[#allocation41_spill] sm:$0xff] %v2829_v60  ;;  %432 = vmatmul.f32.vlgmr.msra.gmra.mxu1 %v2831_v61  ;;  %472 = vmatmul.f32.vlgmr.msra.gmra.mxu3 %v2831_v61 }
  0x6e   : > { %3848 = vst [vmem:[#allocation42_spill] sm:$0xff] %v2831_v61  ;;  %555 = vmatpush.msrb.mxu0 %v2659_v2  ;;  %575 = vmatpush.msrb.mxu1 %v2661_v3  ;;  %v2859_v2 = vld [vmem:[#allocation5 + $0x10] sm:$0xff] }
  0x6f   : > { %3849 = vst [vmem:[#allocation43_spill] sm:$0xff] %v2837_v62  ;;  %615 = vmatpush.msrb.mxu3 %v2663_v4  ;;  %449 = vmatpush.msra.mxu2 %v2847_v0 }
  0x70   : > { %3850 = vst [vmem:[#allocation44_spill] sm:$0xff] %v2843_v63  ;;  %556 = vmatpush.msrb.mxu0 %v2667_v5  ;;  %576 = vmatpush.msrb.mxu1 %v2669_v6 }
  0x71   : > { %3851 = vst [vmem:[#allocation45_spill] sm:$0xff] %v2847_v0  ;;  %616 = vmatpush.msrb.mxu3 %v2671_v7  ;;  %450 = vmatpush.msra.mxu2 %v2853_v1 }
  0x72   : > { %3852 = vst [vmem:[#allocation46_spill] sm:$0xff] %v2853_v1  ;;  %557 = vmatpush.msrb.mxu0 %v2674_v8  ;;  %577 = vmatpush.msrb.mxu1 %v2676_v9 }
  0x73   : > { %3853 = vst [vmem:[#allocation47_spill] sm:$0xff] %v2859_v2  ;;  %617 = vmatpush.msrb.mxu3 %v2680_v10  ;;  %451 = vmatpush.msra.mxu2 %v2859_v2 }
  0x74   : > { %558 = vmatpush.msrb.mxu0 %v2683_v11  ;;  %578 = vmatpush.msrb.mxu1 %v2685_v12 }
  0x75   : > { %618 = vmatpush.msrb.mxu3 %v2689_v13  ;;  %452 = vmatmul.f32.vlgmr.msra.gmra.mxu2 %v2831_v61  ;;  %v3854_v61 = vld [vmem:[#allocation19_spill] sm:$0xff] }
  0x76   : > { %559 = vmatpush.msrb.mxu0 %v2692_v14  ;;  %579 = vmatpush.msrb.mxu1 %v2694_v15 }
  0x77   : > { %595 = vmatpush.msrb.mxu2 %v2705_v19  ;;  %619 = vmatpush.msrb.mxu3 %v2698_v16 }
  0x78   : > { %560 = vmatpush.msrb.mxu0 %v2701_v17  ;;  %580 = vmatpush.msrb.mxu1 %v2703_v18 }
  0x79   : > { %596 = vmatpush.msrb.mxu2 %v2711_v21  ;;  %620 = vmatpush.msrb.mxu3 %v2709_v20 }
  0x7a   : > { %561 = vmatpush.msrb.mxu0 %v2714_v22  ;;  %581 = vmatpush.msrb.mxu1 %v2716_v23 }
  0x7b   : > { %597 = vmatpush.msrb.mxu2 %v2723_v25  ;;  %621 = vmatpush.msrb.mxu3 %v2721_v24 }
  0x7c   : > { %562 = vmatpush.msrb.mxu0 %v2726_v26  ;;  %582 = vmatpush.msrb.mxu1 %v2728_v27 }
  0x7d   : > { %598 = vmatpush.msrb.mxu2 %v2735_v29  ;;  %622 = vmatpush.msrb.mxu3 %v2733_v28 }
  0x7e   : > { %563 = vmatpush.msrb.mxu0 %v2738_v30  ;;  %583 = vmatpush.msrb.mxu1 %v2740_v31 }
  0x7f   : > { %599 = vmatpush.msrb.mxu2 %v2747_v33  ;;  %623 = vmatpush.msrb.mxu3 %v2745_v32 }
  0x80   : > { %564 = vmatpush.msrb.mxu0 %v2750_v34  ;;  %584 = vmatpush.msrb.mxu1 %v2752_v35 }
  0x81   : > { %600 = vmatpush.msrb.mxu2 %v2759_v37  ;;  %624 = vmatpush.msrb.mxu3 %v2757_v36 }
  0x82   : > { %565 = vmatpush.msrb.mxu0 %v2762_v38  ;;  %585 = vmatpush.msrb.mxu1 %v2764_v39 }
  0x83   : > { %601 = vmatpush.msrb.mxu2 %v2771_v41  ;;  %625 = vmatpush.msrb.mxu3 %v2769_v40 }
  0x84   : > { %566 = vmatpush.msrb.mxu0 %v2774_v42  ;;  %586 = vmatpush.msrb.mxu1 %v2776_v43 }
  0x85   : > { %602 = vmatpush.msrb.mxu2 %v2783_v45  ;;  %626 = vmatpush.msrb.mxu3 %v2781_v44 }
  0x86   : > { %567 = vmatpush.msrb.mxu0 %v2786_v46  ;;  %587 = vmatpush.msrb.mxu1 %v2788_v47 }
  0x87   : > { %603 = vmatpush.msrb.mxu2 %v2795_v49  ;;  %627 = vmatpush.msrb.mxu3 %v2793_v48 }
  0x88   : > { %568 = vmatpush.msrb.mxu0 %v2798_v50  ;;  %588 = vmatpush.msrb.mxu1 %v2800_v51 }
  0x89   : > { %604 = vmatpush.msrb.mxu2 %v2807_v53  ;;  %628 = vmatpush.msrb.mxu3 %v2805_v52 }
  0x8a   : > { %569 = vmatpush.msrb.mxu0 %v2810_v54  ;;  %589 = vmatpush.msrb.mxu1 %v2812_v55 }
  0x8b   : > { %605 = vmatpush.msrb.mxu2 %v2819_v57  ;;  %629 = vmatpush.msrb.mxu3 %v2817_v56 }
  0x8c   : > { %570 = vmatpush.msrb.mxu0 %v2822_v58  ;;  %590 = vmatpush.msrb.mxu1 %v2824_v59 }
  0x8d   : > { %606 = vmatpush.msrb.mxu2 %v2837_v62  ;;  %630 = vmatpush.msrb.mxu3 %v2829_v60 }
  0x8e   : > { %716 = vmatpush.msra.mxu0 %v3854_v61  ;;  %736 = vmatpush.msra.mxu1 %v2661_v3 }
  0x8f   : > { %607 = vmatpush.msrb.mxu2 %v2843_v63  ;;  %776 = vmatpush.msra.mxu3 %v2663_v4 }
  0x90   : > { %717 = vmatpush.msra.mxu0 %v2667_v5  ;;  %737 = vmatpush.msra.mxu1 %v2669_v6 }
  0x91   : > { %608 = vmatpush.msrb.mxu2 %v2847_v0  ;;  %777 = vmatpush.msra.mxu3 %v2671_v7 }
  0x92   : > { %718 = vmatpush.msra.mxu0 %v2674_v8  ;;  %738 = vmatpush.msra.mxu1 %v2676_v9 }
  0x93   : > { %609 = vmatpush.msrb.mxu2 %v2853_v1  ;;  %778 = vmatpush.msra.mxu3 %v2680_v10 }
  0x94   : > { %719 = vmatpush.msra.mxu0 %v2683_v11  ;;  %739 = vmatpush.msra.mxu1 %v2685_v12 }
  0x95   : > { %610 = vmatpush.msrb.mxu2 %v2859_v2  ;;  %779 = vmatpush.msra.mxu3 %v2689_v13 }
  0x96   : > { %720 = vmatpush.msra.mxu0 %v2692_v14  ;;  %740 = vmatpush.msra.mxu1 %v2694_v15 }
  0x97   : > { %756 = vmatpush.msra.mxu2 %v2705_v19  ;;  %780 = vmatpush.msra.mxu3 %v2698_v16 }
  0x98   : > { %721 = vmatpush.msra.mxu0 %v2701_v17  ;;  %741 = vmatpush.msra.mxu1 %v2703_v18 }
  0x99   : > { %757 = vmatpush.msra.mxu2 %v2711_v21  ;;  %781 = vmatpush.msra.mxu3 %v2709_v20 }
  0x9a   : > { %722 = vmatpush.msra.mxu0 %v2714_v22  ;;  %742 = vmatpush.msra.mxu1 %v2716_v23 }
  0x9b   : > { %758 = vmatpush.msra.mxu2 %v2723_v25  ;;  %782 = vmatpush.msra.mxu3 %v2721_v24 }
  0x9c   : > { %723 = vmatpush.msra.mxu0 %v2726_v26  ;;  %743 = vmatpush.msra.mxu1 %v2728_v27 }
  0x9d   : > { %759 = vmatpush.msra.mxu2 %v2735_v29  ;;  %783 = vmatpush.msra.mxu3 %v2733_v28 }
  0x9e   : > { %724 = vmatpush.msra.mxu0 %v2738_v30  ;;  %744 = vmatpush.msra.mxu1 %v2740_v31 }
  0x9f   : > { %760 = vmatpush.msra.mxu2 %v2747_v33  ;;  %784 = vmatpush.msra.mxu3 %v2745_v32 }
  0xa0   : > { %725 = vmatpush.msra.mxu0 %v2750_v34  ;;  %745 = vmatpush.msra.mxu1 %v2752_v35 }
  0xa1   : > { %761 = vmatpush.msra.mxu2 %v2759_v37  ;;  %785 = vmatpush.msra.mxu3 %v2757_v36 }
  0xa2   : > { %726 = vmatpush.msra.mxu0 %v2762_v38  ;;  %746 = vmatpush.msra.mxu1 %v2764_v39 }
  0xa3   : > { %762 = vmatpush.msra.mxu2 %v2771_v41  ;;  %786 = vmatpush.msra.mxu3 %v2769_v40 }
  0xa4   : > { %727 = vmatpush.msra.mxu0 %v2774_v42  ;;  %747 = vmatpush.msra.mxu1 %v2776_v43 }
  0xa5   : > { %763 = vmatpush.msra.mxu2 %v2783_v45  ;;  %787 = vmatpush.msra.mxu3 %v2781_v44 }
  0xa6   : > { %728 = vmatpush.msra.mxu0 %v2786_v46  ;;  %748 = vmatpush.msra.mxu1 %v2788_v47 }
  0xa7   : > { %764 = vmatpush.msra.mxu2 %v2795_v49  ;;  %788 = vmatpush.msra.mxu3 %v2793_v48 }
  0xa8   : > { %729 = vmatpush.msra.mxu0 %v2798_v50  ;;  %749 = vmatpush.msra.mxu1 %v2800_v51 }
  0xa9   : > { %765 = vmatpush.msra.mxu2 %v2807_v53  ;;  %789 = vmatpush.msra.mxu3 %v2805_v52 }
  0xaa   : > { %730 = vmatpush.msra.mxu0 %v2810_v54  ;;  %750 = vmatpush.msra.mxu1 %v2812_v55  ;;  %v392_v55 = vld [vmem:[%s2640_s11] sm:$0xff]  ;;  %v393_v54 = vld [vmem:[%s2640_s11 + $0x8] sm:$0xff] }
  0xab   : > { %766 = vmatpush.msra.mxu2 %v2819_v57  ;;  %790 = vmatpush.msra.mxu3 %v2817_v56 }
  0xac   : > { %731 = vmatpush.msra.mxu0 %v2822_v58  ;;  %751 = vmatpush.msra.mxu1 %v2824_v59  ;;  %v395_v59 = vld [vmem:[%s2640_s11 + $0x18] sm:$0xff] }
  0xad   : > { %767 = vmatpush.msra.mxu2 %v2837_v62  ;;  %791 = vmatpush.msra.mxu3 %v2829_v60 }
  0xaf   : > { %768 = vmatpush.msra.mxu2 %v2843_v63 }
  0xb1   : > { %769 = vmatpush.msra.mxu2 %v2847_v0 }
  0xb3   : > { %770 = vmatpush.msra.mxu2 %v2853_v1 }
  0xb5   : > { %771 = vmatpush.msra.mxu2 %v2859_v2 }
  0xe9   : > { %v413_v56 = vpop.f32.mrf.mxu0 }
  0xea   : > { %v476_v52 = vadd.f32 %v413_v56, %v392_v55  ;;  %v433_v51 = vpop.f32.mrf.mxu1  ;;  %v394_v55 = vld [vmem:[%s2640_s11 + $0x10] sm:$0xff] }
  0xeb   : > { %v477_v50 = vadd.f32 %v433_v51, %v393_v54 }
  0xec   : > { %v1862_v58 = vmul.f32 -1.442695, %v476_v52 }
  0xed   : > { %v1863_v48 = vmul.f32 -1.442695, %v477_v50 }
  0xee   : > { %2028 = vpow2.f32 %v1862_v58 }
  0xef   : > { %2030 = vpow2.f32 %v1863_v48 }
  0xf0   : > { %v473_v60 = vpop.f32.mrf.mxu3 }
  0xf1   : > { %v479_v63 = vadd.f32 %v473_v60, %v395_v59 }
  0xf3   : > { %v1864_v0 = vmul.f32 -1.442695, %v479_v63 }
  0xf4   : > { %v2029_v47 = vpop.eup %2028 }
  0xf5   : > { %v2031_v1 = vpop.eup %2030  ;;  %v483_v46 = vadd.f32 1.0, %v2029_v47  ;;  %2032 = vpow2.f32 %v1864_v0 }
  0xf6   : > { %v502_v2 = vadd.f32 1.0, %v2031_v1 }
  0xf7   : > { %2034 = vrcp.f32 %v483_v46  ;;  %v495_v63 = vand.u32 2147483648, %v483_v46  ;;  %v493_v44 = vand.u32 2147483647, %v483_v46  ;;  %vm489_vm2 = vweird.f32 %v483_v46 }
  0xf8   : > { %2036 = vrcp.f32 %v502_v2  ;;  %v453_v56 = vpop.f32.mrf.mxu2  ;;  %v514_v0 = vand.u32 2147483648, %v502_v2  ;;  %vm508_vm3 = vweird.f32 %v502_v2 }
  0xf9   : > { %v478_v54 = vadd.f32 %v453_v56, %v394_v55  ;;  %v512_v56 = vand.u32 2147483647, %v502_v2  ;;  %v496_v40 = vor.u32 1.1754944e-38, %v495_v63  ;;  %vm494_vm6 = vcmp.eq.f32.partialorder %v493_v44, 8.507059e+37 }
  0xfb   : > { %v2033_v51 = vpop.eup %2032  ;;  %vm513_vm7 = vcmp.eq.f32.partialorder %v512_v56, 8.507059e+37  ;;  %v3862_v56 = vld [vmem:[#allocation38_spill] sm:$0xff] }
  0xfc   : > { %v522_v50 = vadd.f32 1.0, %v2033_v51 }
  0xfd   : > { %v2035_v52 = vpop.eup %2034 }
  0xfe   : > { %v2037_v48 = vpop.eup %2036  ;;  %v485_v58 = vmul.f32 %v2035_v52, %v483_v46  ;;  %2038 = vrcp.f32 %v522_v50  ;;  %vm490_vm0 = vweird.f32 %v2035_v52  ;;  %vm528_vm10 = vweird.f32 %v522_v50 }
  0xff   : > { %v504_v59 = vmul.f32 %v2037_v48, %v502_v2  ;;  %2040 = vtanh.f32 %v478_v54  ;;  %vm509_vm1 = vweird.f32 %v2037_v48  ;;  %vm491_vm4 = vmor %vm489_vm2, %vm490_vm0  ;;  %v3871_v2 = vld [vmem:[#allocation30_spill] sm:$0xff] }
 0x100   : > { %v486_v47 = vsub.f32 1.0, %v485_v58  ;;  %vm510_vm5 = vmor %vm508_vm3, %vm509_vm1  ;;  %v515_v58 = vor.u32 1.1754944e-38, %v514_v0  ;;  %v534_v0 = vand.u32 2147483648, %v522_v50 }
 0x101   : > { %v505_v60 = vsub.f32 1.0, %v504_v59  ;;  %v391_v59 = vld [vmem:[#allocation13] sm:$0xff] }
 0x102   : > { %v487_v1 = vmul.f32 %v2035_v52, %v486_v47  ;;  %v545_v47 = vstv %s544_s30  ;;  %s1721_s30 = sshll.u32 %s3700_s6, 4  ;;  %s1722_s30 = int_to_ptr.hbm [resolvable:$true] %s1721_s30 }
 0x103   : > { %v506_v55 = vmul.f32 %v2037_v48, %v505_v60  ;;  %vm2993_vm8 = vcmp.eq.s32.totalorder %v545_v47, 1  ;;  %v3867_v47 = vld [vmem:[#allocation27_spill] sm:$0xff] }
 0x104   : > { %v2039_v62 = vpop.eup %2038  ;;  %v488_v51 = vadd.f32 %v2035_v52, %v487_v1 }
 0x105   : > { %v2041_v43 = vpop.eup %2040  ;;  %v524_v42 = vmul.f32 %v2039_v62, %v522_v50  ;;  %v507_v54 = vadd.f32 %v2037_v48, %v506_v55  ;;  %vm529_vm9 = vweird.f32 %v2039_v62 }
 0x106   : > { %v492_v57 = vsel %vm491_vm4, %v2035_v52, %v488_v51  ;;  %vm530_vm11 = vmor %vm528_vm10, %vm529_vm9  ;;  %v3860_v52 = vld [vmem:[#allocation22_spill] sm:$0xff]  ;;  %v3863_v51 = vld [vmem:[#allocation24_spill] sm:$0xff] }
 0x107   : > { %v525_v39 = vsub.f32 1.0, %v524_v42  ;;  %v497_v38 = vsel %vm494_vm6, %v496_v40, %v492_v57  ;;  %v511_v60 = vsel %vm510_vm5, %v2037_v48, %v507_v54  ;;  %v532_v40 = vand.u32 2147483647, %v522_v50  ;;  %v3857_v57 = vld [vmem:[#allocation42_spill] sm:$0xff]  ;;  %v3859_v50 = vld [vmem:[#allocation21_spill] sm:$0xff]  ;;  %v3861_v48 = vld [vmem:[#allocation23_spill] sm:$0xff] }
 0x108   : > { %v516_v36 = vsel %vm513_vm7, %v515_v58, %v511_v60  ;;  %v539_v53 = vmul.f32 %v2041_v43, %v497_v38  ;;  %v3864_v54 = vld [vmem:[#allocation25_spill] sm:$0xff]  ;;  %v3865_v58 = vld [vmem:[#allocation26_spill] sm:$0xff]  ;;  %v3868_v60 = vld [vmem:[#allocation28_spill] sm:$0xff] }
 0x109   : > { %v526_v1 = vmul.f32 %v2039_v62, %v525_v39  ;;  %v538_v46 = vmul.f32 %v516_v36, %v391_v59  ;;  %v535_v39 = vor.u32 1.1754944e-38, %v534_v0  ;;  %vm533_vm12 = vcmp.eq.f32.partialorder %v532_v40, 8.507059e+37  ;;  %v3874_v0 = vld [vmem:[#allocation45_spill] sm:$0xff] }
 0x10a   : > { %v3875_v40 = vld [vmem:[#allocation33_spill] sm:$0xff] }
 0x10b   : > { %v540_v63 = vadd.f32 %v539_v53, %v538_v46  ;;  %v527_v55 = vadd.f32 %v2039_v62, %v526_v1  ;;  %v3869_v1 = vld [vmem:[#allocation29_spill] sm:$0xff]  ;;  %v3870_v46 = vld [vmem:[#allocation44_spill] sm:$0xff] }
 0x10d   : > { %2042 = vtanh.f32 %v540_v63  ;;  %v2999_v42 = vsel %vm2993_vm8, %v540_v63, %v391_v59  ;;  %v531_v38 = vsel %vm530_vm11, %v2039_v62, %v527_v55  ;;  %v3858_v62 = vld [vmem:[#allocation34_spill] sm:$0xff]  ;;  %v3866_v59 = vld [vmem:[#allocation43_spill] sm:$0xff]  ;;  %v3873_v55 = vld [vmem:[#allocation32_spill] sm:$0xff] }
 0x10e   : > { %v536_v43 = vsel %vm533_vm12, %v535_v39, %v531_v38  ;;  %v3872_v63 = vld [vmem:[#allocation31_spill] sm:$0xff]  ;;  %v3877_v39 = vld [vmem:[#allocation36_spill] sm:$0xff] }
 0x10f   : > { %v3876_v38 = vld [vmem:[#allocation35_spill] sm:$0xff] }
 0x113   : > { %v2043_v36 = vpop.eup %2042 }
 0x114   : > { %v542_v44 = vmul.f32 %v2043_v36, %v536_v43  ;;  %v3878_v36 = vld [vmem:[#allocation46_spill] sm:$0xff]  ;;  %v3879_v43 = vld [vmem:[#allocation37_spill] sm:$0xff] }
 0x116   : > { %v3004_v53 = vsel %vm2993_vm8, %v542_v44, %v3857_v57  ;;  %v3880_v44 = vld [vmem:[#allocation39_spill] sm:$0xff]  ;;  %v3881_v57 = vld [vmem:[#allocation40_spill] sm:$0xff] }
 0x117   : > { %549 = vst [vmem:[%s2655_s26] sm:$0xff] %v3004_v53  ;;  %571 = vmatmul.f32.vlgmr.msrb.gmra.mxu0 %v3004_v53  ;;  %591 = vmatmul.f32.vlgmr.msrb.gmra.mxu1 %v3004_v53 }
 0x118   : > { %611 = vmatmul.f32.vlgmr.msrb.gmra.mxu2 %v3004_v53  ;;  %631 = vmatmul.f32.vlgmr.msrb.gmra.mxu3 %v3004_v53 }
 0x119   : > { %877 = vmatpush.msrb.mxu0 %v3854_v61  ;;  %897 = vmatpush.msrb.mxu1 %v2661_v3 }
 0x11a   : > { %917 = vmatpush.msrb.mxu2 %v2705_v19  ;;  %937 = vmatpush.msrb.mxu3 %v2663_v4 }
 0x11b   : > { %878 = vmatpush.msrb.mxu0 %v2667_v5  ;;  %898 = vmatpush.msrb.mxu1 %v2669_v6 }
 0x11c   : > { %918 = vmatpush.msrb.mxu2 %v2711_v21  ;;  %938 = vmatpush.msrb.mxu3 %v2671_v7 }
 0x11d   : > { %879 = vmatpush.msrb.mxu0 %v2674_v8  ;;  %899 = vmatpush.msrb.mxu1 %v2676_v9 }
 0x11e   : > { %919 = vmatpush.msrb.mxu2 %v2723_v25  ;;  %939 = vmatpush.msrb.mxu3 %v2680_v10 }
 0x11f   : > { %880 = vmatpush.msrb.mxu0 %v2683_v11  ;;  %900 = vmatpush.msrb.mxu1 %v2685_v12 }
 0x120   : > { %920 = vmatpush.msrb.mxu2 %v2735_v29  ;;  %940 = vmatpush.msrb.mxu3 %v2689_v13 }
 0x121   : > { %881 = vmatpush.msrb.mxu0 %v2692_v14  ;;  %901 = vmatpush.msrb.mxu1 %v2694_v15 }
 0x122   : > { %921 = vmatpush.msrb.mxu2 %v2747_v33  ;;  %941 = vmatpush.msrb.mxu3 %v2698_v16 }
 0x123   : > { %882 = vmatpush.msrb.mxu0 %v2701_v17  ;;  %902 = vmatpush.msrb.mxu1 %v2703_v18 }
 0x124   : > { %922 = vmatpush.msrb.mxu2 %v2759_v37  ;;  %942 = vmatpush.msrb.mxu3 %v2709_v20 }
 0x125   : > { %883 = vmatpush.msrb.mxu0 %v2714_v22  ;;  %903 = vmatpush.msrb.mxu1 %v2716_v23 }
 0x126   : > { %923 = vmatpush.msrb.mxu2 %v2771_v41  ;;  %943 = vmatpush.msrb.mxu3 %v2721_v24 }
 0x127   : > { %884 = vmatpush.msrb.mxu0 %v2726_v26  ;;  %904 = vmatpush.msrb.mxu1 %v2728_v27 }
 0x128   : > { %924 = vmatpush.msrb.mxu2 %v2783_v45  ;;  %944 = vmatpush.msrb.mxu3 %v2733_v28 }
 0x129   : > { %885 = vmatpush.msrb.mxu0 %v2738_v30  ;;  %905 = vmatpush.msrb.mxu1 %v2740_v31 }
 0x12a   : > { %925 = vmatpush.msrb.mxu2 %v2795_v49  ;;  %945 = vmatpush.msrb.mxu3 %v2745_v32 }
 0x12b   : > { %886 = vmatpush.msrb.mxu0 %v2750_v34  ;;  %906 = vmatpush.msrb.mxu1 %v2752_v35 }
 0x12c   : > { %926 = vmatpush.msrb.mxu2 %v3858_v62  ;;  %946 = vmatpush.msrb.mxu3 %v3859_v50 }
 0x12d   : > { %887 = vmatpush.msrb.mxu0 %v3860_v52  ;;  %907 = vmatpush.msrb.mxu1 %v3861_v48 }
 0x12e   : > { %927 = vmatpush.msrb.mxu2 %v3862_v56  ;;  %947 = vmatpush.msrb.mxu3 %v3863_v51 }
 0x12f   : > { %888 = vmatpush.msrb.mxu0 %v3864_v54  ;;  %908 = vmatpush.msrb.mxu1 %v3865_v58  ;;  %v1867_v58 = vld [vmem:[%s2640_s11 + $0x30] sm:$0xff] }
 0x130   : > { %928 = vmatpush.msrb.mxu2 %v3866_v59  ;;  %948 = vmatpush.msrb.mxu3 %v3867_v47 }
 0x131   : > { %889 = vmatpush.msrb.mxu0 %v3868_v60  ;;  %909 = vmatpush.msrb.mxu1 %v3869_v1 }
 0x132   : > { %929 = vmatpush.msrb.mxu2 %v3870_v46  ;;  %949 = vmatpush.msrb.mxu3 %v3871_v2  ;;  %v1866_v2 = vld [vmem:[%s2640_s11 + $0x28] sm:$0xff] }
 0x133   : > { %890 = vmatpush.msrb.mxu0 %v3872_v63  ;;  %910 = vmatpush.msrb.mxu1 %v3873_v55  ;;  %v3882_v63 = vld [vmem:[#allocation47_spill] sm:$0xff]  ;;  %v3883_v55 = vld [vmem:[#allocation41_spill] sm:$0xff] }
 0x134   : > { %930 = vmatpush.msrb.mxu2 %v3874_v0  ;;  %950 = vmatpush.msrb.mxu3 %v3875_v40  ;;  %v1865_v0 = vld [vmem:[%s2640_s11 + $0x20] sm:$0xff] }
 0x135   : > { %891 = vmatpush.msrb.mxu0 %v3876_v38  ;;  %911 = vmatpush.msrb.mxu1 %v3877_v39 }
 0x136   : > { %931 = vmatpush.msrb.mxu2 %v3878_v36  ;;  %951 = vmatpush.msrb.mxu3 %v3879_v43  ;;  %v1868_v43 = vld [vmem:[%s2640_s11 + $0x38] sm:$0xff] }
 0x137   : > { %892 = vmatpush.msrb.mxu0 %v3880_v44  ;;  %912 = vmatpush.msrb.mxu1 %v3881_v57 }
 0x138   : > { %932 = vmatpush.msrb.mxu2 %v3882_v63  ;;  %952 = vmatpush.msrb.mxu3 %v3883_v55 }
 0x194   : > { %v572_v40 = vpop.f32.mrf.mxu0  ;;  %v592_v46 = vpop.f32.mrf.mxu1 }
 0x195   : > { %v635_v38 = vadd.f32 %v1865_v0, %v572_v40  ;;  %v636_v1 = vadd.f32 %v1866_v2, %v592_v46 }
 0x197   : > { %v1869_v39 = vmul.f32 -1.442695, %v635_v38  ;;  %v1870_v60 = vmul.f32 -1.442695, %v636_v1 }
 0x199   : > { %2044 = vpow2.f32 %v1869_v39 }
 0x19a   : > { %2046 = vpow2.f32 %v1870_v60 }
 0x19b   : > { %v632_v44 = vpop.f32.mrf.mxu3  ;;  %v612_v0 = vpop.f32.mrf.mxu2 }
 0x19c   : > { %v638_v36 = vadd.f32 %v1868_v43, %v632_v44  ;;  %v637_v40 = vadd.f32 %v1867_v58, %v612_v0 }
 0x19e   : > { %v1871_v57 = vmul.f32 -1.442695, %v638_v36 }
 0x19f   : > { %v2045_v47 = vpop.eup %2044 }
 0x1a0   : > { %v2047_v63 = vpop.eup %2046  ;;  %v642_v59 = vadd.f32 1.0, %v2045_v47  ;;  %2048 = vpow2.f32 %v1871_v57 }
 0x1a1   : > { %v661_v55 = vadd.f32 1.0, %v2047_v63 }
 0x1a2   : > { %2050 = vrcp.f32 %v642_v59  ;;  %v654_v36 = vand.u32 2147483648, %v642_v59  ;;  %v652_v57 = vand.u32 2147483647, %v642_v59  ;;  %vm648_vm15 = vweird.f32 %v642_v59 }
 0x1a3   : > { %2052 = vrcp.f32 %v661_v55  ;;  %v673_v43 = vand.u32 2147483648, %v661_v55  ;;  %v671_v0 = vand.u32 2147483647, %v661_v55  ;;  %vm667_vm0 = vweird.f32 %v661_v55 }
 0x1a4   : > { %v655_v51 = vor.u32 1.1754944e-38, %v654_v36  ;;  %vm653_vm3 = vcmp.eq.f32.partialorder %v652_v57, 8.507059e+37 }
 0x1a5   : > { %vm672_vm4 = vcmp.eq.f32.partialorder %v671_v0, 8.507059e+37 }
 0x1a6   : > { %v2049_v46 = vpop.eup %2048 }
 0x1a7   : > { %v681_v2 = vadd.f32 1.0, %v2049_v46 }
 0x1a8   : > { %v2051_v1 = vpop.eup %2050 }
 0x1a9   : > { %v2053_v38 = vpop.eup %2052  ;;  %v644_v39 = vmul.f32 %v2051_v1, %v642_v59  ;;  %2054 = vrcp.f32 %v681_v2  ;;  %vm649_vm13 = vweird.f32 %v2051_v1  ;;  %vm687_vm7 = vweird.f32 %v681_v2 }
 0x1aa   : > { %v663_v47 = vmul.f32 %v2053_v38, %v661_v55  ;;  %2056 = vtanh.f32 %v637_v40  ;;  %vm668_vm14 = vweird.f32 %v2053_v38  ;;  %vm650_vm1 = vmor %vm648_vm15, %vm649_vm13 }
 0x1ab   : > { %v645_v60 = vsub.f32 1.0, %v644_v39  ;;  %vm669_vm2 = vmor %vm667_vm0, %vm668_vm14 }
 0x1ac   : > { %v664_v63 = vsub.f32 1.0, %v663_v47  ;;  %v674_v47 = vor.u32 1.1754944e-38, %v673_v43  ;;  %v693_v43 = vand.u32 2147483648, %v681_v2 }
 0x1ad   : > { %v646_v44 = vmul.f32 %v2051_v1, %v645_v60  ;;  %v705_v60 = vstv %s704_s18 }
 0x1ae   : > { %v665_v58 = vmul.f32 %v2053_v38, %v664_v63  ;;  %vm706_vm5 = vcmp.eq.s32.totalorder %v705_v60, 1 }
 0x1af   : > { %v2055_v46 = vpop.eup %2054  ;;  %v647_v54 = vadd.f32 %v2051_v1, %v646_v44 }
 0x1b0   : > { %v666_v56 = vadd.f32 %v2053_v38, %v665_v58  ;;  %v683_v39 = vmul.f32 %v2055_v46, %v681_v2  ;;  %v2057_v48 = vpop.eup %2056  ;;  %vm688_vm6 = vweird.f32 %v2055_v46  ;;  %v1875_v58 = vld [vmem:[%s2640_s11 + $0x50] sm:$0xff] }
 0x1b1   : > { %v651_v40 = vsel %vm650_vm1, %v2051_v1, %v647_v54  ;;  %vm689_vm8 = vmor %vm687_vm7, %vm688_vm6 }
 0x1b2   : > { %v656_v52 = vsel %vm653_vm3, %v655_v51, %v651_v40  ;;  %v670_v50 = vsel %vm669_vm2, %v2053_v38, %v666_v56  ;;  %v684_v63 = vsub.f32 1.0, %v683_v39  ;;  %v691_v56 = vand.u32 2147483647, %v681_v2 }
 0x1b3   : > { %v675_v62 = vsel %vm672_vm4, %v674_v47, %v670_v50  ;;  %v698_v35 = vmul.f32 %v2057_v48, %v656_v52  ;;  %v694_v50 = vor.u32 1.1754944e-38, %v693_v43 }
 0x1b4   : > { %v697_v44 = vmul.f32 %v675_v62, %v2999_v42  ;;  %v685_v59 = vmul.f32 %v2055_v46, %v684_v63  ;;  %vm692_vm9 = vcmp.eq.f32.partialorder %v691_v56, 8.507059e+37 }
 0x1b6   : > { %v699_v55 = vadd.f32 %v698_v35, %v697_v44  ;;  %v686_v36 = vadd.f32 %v2055_v46, %v685_v59 }
 0x1b8   : > { %2058 = vtanh.f32 %v699_v55  ;;  %v3090_v54 = vsel %vm706_vm5, %v699_v55, %v2999_v42  ;;  %v690_v51 = vsel %vm689_vm8, %v2055_v46, %v686_v36 }
 0x1b9   : > { %v695_v62 = vsel %vm692_vm9, %v694_v50, %v690_v51 }
 0x1be   : > { %v2059_v52 = vpop.eup %2058 }
 0x1bf   : > { %v701_v48 = vmul.f32 %v2059_v52, %v695_v62 }
 0x1c1   : > { %v3094_v35 = vsel %vm706_vm5, %v701_v48, %v3004_v53 }
 0x1c2   : > { %1872 = vst [vmem:[%s2655_s26 + $0x8] sm:$0xff] %v3094_v35  ;;  %732 = vmatmul.f32.vlgmr.msra.gmra.mxu0 %v3094_v35  ;;  %752 = vmatmul.f32.vlgmr.msra.gmra.mxu1 %v3094_v35 }
 0x1c3   : > { %772 = vmatmul.f32.vlgmr.msra.gmra.mxu2 %v3094_v35  ;;  %792 = vmatmul.f32.vlgmr.msra.gmra.mxu3 %v3094_v35 }
 0x1c4   : > { %1038 = vmatpush.msra.mxu0 %v3854_v61  ;;  %1058 = vmatpush.msra.mxu1 %v2661_v3  ;;  %v3885_v3 = vld [vmem:[#allocation20_spill] sm:$0xff] }
 0x1c5   : > { %1078 = vmatpush.msra.mxu2 %v2705_v19  ;;  %1098 = vmatpush.msra.mxu3 %v2663_v4  ;;  %v3886_v4 = vld [vmem:[#allocation34_spill] sm:$0xff]  ;;  %v3901_v19 = vld [vmem:[#allocation32_spill] sm:$0xff] }
 0x1c6   : > { %1039 = vmatpush.msra.mxu0 %v2667_v5  ;;  %1059 = vmatpush.msra.mxu1 %v2669_v6  ;;  %v3887_v5 = vld [vmem:[#allocation21_spill] sm:$0xff]  ;;  %v3888_v6 = vld [vmem:[#allocation22_spill] sm:$0xff] }
 0x1c7   : > { %1079 = vmatpush.msra.mxu2 %v2711_v21  ;;  %1099 = vmatpush.msra.mxu3 %v2671_v7  ;;  %v3889_v7 = vld [vmem:[#allocation23_spill] sm:$0xff]  ;;  %v3903_v21 = vld [vmem:[#allocation33_spill] sm:$0xff] }
 0x1c8   : > { %1040 = vmatpush.msra.mxu0 %v2674_v8  ;;  %1060 = vmatpush.msra.mxu1 %v2676_v9  ;;  %v3890_v8 = vld [vmem:[#allocation38_spill] sm:$0xff]  ;;  %v3891_v9 = vld [vmem:[#allocation24_spill] sm:$0xff] }
 0x1c9   : > { %1080 = vmatpush.msra.mxu2 %v2723_v25  ;;  %1100 = vmatpush.msra.mxu3 %v2680_v10  ;;  %v3892_v10 = vld [vmem:[#allocation25_spill] sm:$0xff] }
 0x1ca   : > { %1041 = vmatpush.msra.mxu0 %v2683_v11  ;;  %1061 = vmatpush.msra.mxu1 %v2685_v12  ;;  %v3893_v11 = vld [vmem:[#allocation26_spill] sm:$0xff]  ;;  %v3894_v12 = vld [vmem:[#allocation43_spill] sm:$0xff]  ;;  %v3907_v25 = vld [vmem:[#allocation37_spill] sm:$0xff] }
 0x1cb   : > { %1081 = vmatpush.msra.mxu2 %v2735_v29  ;;  %1101 = vmatpush.msra.mxu3 %v2689_v13  ;;  %v3895_v13 = vld [vmem:[#allocation27_spill] sm:$0xff]  ;;  %v3911_v29 = vld [vmem:[#allocation41_spill] sm:$0xff] }
 0x1cc   : > { %1042 = vmatpush.msra.mxu0 %v2692_v14  ;;  %1062 = vmatpush.msra.mxu1 %v2694_v15  ;;  %v3896_v14 = vld [vmem:[#allocation28_spill] sm:$0xff]  ;;  %v3897_v15 = vld [vmem:[#allocation29_spill] sm:$0xff] }
 0x1cd   : > { %1082 = vmatpush.msra.mxu2 %v2747_v33  ;;  %1102 = vmatpush.msra.mxu3 %v2698_v16  ;;  %v3898_v16 = vld [vmem:[#allocation44_spill] sm:$0xff] }
 0x1ce   : > { %1043 = vmatpush.msra.mxu0 %v2701_v17  ;;  %1063 = vmatpush.msra.mxu1 %v2703_v18  ;;  %v3899_v17 = vld [vmem:[#allocation30_spill] sm:$0xff]  ;;  %v3900_v18 = vld [vmem:[#allocation31_spill] sm:$0xff] }
 0x1cf   : > { %1083 = vmatpush.msra.mxu2 %v2759_v37  ;;  %1103 = vmatpush.msra.mxu3 %v2709_v20  ;;  %v3902_v20 = vld [vmem:[#allocation45_spill] sm:$0xff] }
 0x1d0   : > { %1044 = vmatpush.msra.mxu0 %v2714_v22  ;;  %1064 = vmatpush.msra.mxu1 %v2716_v23  ;;  %v3904_v22 = vld [vmem:[#allocation35_spill] sm:$0xff]  ;;  %v3905_v23 = vld [vmem:[#allocation36_spill] sm:$0xff] }
 0x1d1   : > { %1084 = vmatpush.msra.mxu2 %v2771_v41  ;;  %1104 = vmatpush.msra.mxu3 %v2721_v24  ;;  %v3906_v24 = vld [vmem:[#allocation46_spill] sm:$0xff] }
 0x1d2   : > { %1045 = vmatpush.msra.mxu0 %v2726_v26  ;;  %1065 = vmatpush.msra.mxu1 %v2728_v27  ;;  %v3908_v26 = vld [vmem:[#allocation39_spill] sm:$0xff]  ;;  %v3909_v27 = vld [vmem:[#allocation40_spill] sm:$0xff] }
 0x1d3   : > { %1085 = vmatpush.msra.mxu2 %v2783_v45  ;;  %1105 = vmatpush.msra.mxu3 %v2733_v28  ;;  %v3910_v28 = vld [vmem:[#allocation47_spill] sm:$0xff] }
 0x1d4   : > { %1046 = vmatpush.msra.mxu0 %v2738_v30  ;;  %1066 = vmatpush.msra.mxu1 %v2740_v31  ;;  %v1873_v30 = vld [vmem:[%s2640_s11 + $0x40] sm:$0xff]  ;;  %v1874_v31 = vld [vmem:[%s2640_s11 + $0x48] sm:$0xff] }
 0x1d5   : > { %1086 = vmatpush.msra.mxu2 %v2795_v49  ;;  %1106 = vmatpush.msra.mxu3 %v2745_v32  ;;  %v1876_v49 = vld [vmem:[%s2640_s11 + $0x58] sm:$0xff] }
 0x1d6   : > { %1047 = vmatpush.msra.mxu0 %v2750_v34  ;;  %1067 = vmatpush.msra.mxu1 %v3885_v3 }
 0x1d7   : > { %1087 = vmatpush.msra.mxu2 %v3886_v4  ;;  %1107 = vmatpush.msra.mxu3 %v3887_v5 }
 0x1d8   : > { %1048 = vmatpush.msra.mxu0 %v3888_v6  ;;  %1068 = vmatpush.msra.mxu1 %v3889_v7 }
 0x1d9   : > { %1088 = vmatpush.msra.mxu2 %v3890_v8  ;;  %1108 = vmatpush.msra.mxu3 %v3891_v9  ;;  %v866_v8 = vstv %s865_s14 }
 0x1da   : > { %1049 = vmatpush.msra.mxu0 %v3892_v10  ;;  %1069 = vmatpush.msra.mxu1 %v3893_v11  ;;  %vm867_vm2 = vcmp.eq.s32.totalorder %v866_v8, 1  ;;  %v3324_v8 = vld [vmem:[#allocation5 + $0x80] sm:$0xff] }
 0x1db   : > { %1089 = vmatpush.msra.mxu2 %v3894_v12  ;;  %1109 = vmatpush.msra.mxu3 %v3895_v13  ;;  %3920 = vst [vmem:[#allocation38_spill] sm:$0xff] %v3324_v8 }
 0x1dc   : > { %1050 = vmatpush.msra.mxu0 %v3896_v14  ;;  %1070 = vmatpush.msra.mxu1 %v3897_v15 }
 0x1dd   : > { %1090 = vmatpush.msra.mxu2 %v3898_v16  ;;  %1110 = vmatpush.msra.mxu3 %v3899_v17 }
 0x1de   : > { %1051 = vmatpush.msra.mxu0 %v3900_v18  ;;  %1071 = vmatpush.msra.mxu1 %v3901_v19 }
 0x1df   : > { %1091 = vmatpush.msra.mxu2 %v3902_v20  ;;  %1111 = vmatpush.msra.mxu3 %v3903_v21 }
 0x1e0   : > { %1052 = vmatpush.msra.mxu0 %v3904_v22  ;;  %1072 = vmatpush.msra.mxu1 %v3905_v23 }
 0x1e1   : > { %1092 = vmatpush.msra.mxu2 %v3906_v24  ;;  %1112 = vmatpush.msra.mxu3 %v3907_v25 }
 0x1e2   : > { %1053 = vmatpush.msra.mxu0 %v3908_v26  ;;  %1073 = vmatpush.msra.mxu1 %v3909_v27 }
 0x1e3   : > { %1093 = vmatpush.msra.mxu2 %v3910_v28  ;;  %1113 = vmatpush.msra.mxu3 %v3911_v29  ;;  %v3195_v28 = vld [vmem:[#allocation5 + $0x1e8] sm:$0xff]  ;;  %v3201_v29 = vld [vmem:[#allocation5 + $0x1f8] sm:$0xff] }
 0x23f   : > { %v733_v32 = vpop.f32.mrf.mxu0  ;;  %v753_v33 = vpop.f32.mrf.mxu1 }
 0x240   : > { %v796_v34 = vadd.f32 %v1873_v30, %v733_v32  ;;  %v797_v37 = vadd.f32 %v1874_v31, %v753_v33  ;;  %v3204_v30 = vld [vmem:[#allocation5 + $0x1c0] sm:$0xff]  ;;  %v3207_v31 = vld [vmem:[#allocation5 + $0x1c8] sm:$0xff]  ;;  %v3210_v32 = vld [vmem:[#allocation5 + $0x1d0] sm:$0xff] }
 0x241   : > { %v3213_v33 = vld [vmem:[#allocation5 + $0x1d8] sm:$0xff] }
 0x242   : > { %v1877_v41 = vmul.f32 -1.442695, %v796_v34  ;;  %v1878_v45 = vmul.f32 -1.442695, %v797_v37  ;;  %v3216_v34 = vld [vmem:[#allocation5 + $0x1a0] sm:$0xff]  ;;  %v3219_v37 = vld [vmem:[#allocation5 + $0x1a8] sm:$0xff] }
 0x244   : > { %2060 = vpow2.f32 %v1877_v41  ;;  %v3222_v41 = vld [vmem:[#allocation5 + $0x1b0] sm:$0xff] }
 0x245   : > { %2062 = vpow2.f32 %v1878_v45  ;;  %v3225_v45 = vld [vmem:[#allocation5 + $0x1b8] sm:$0xff] }
 0x246   : > { %v793_v61 = vpop.f32.mrf.mxu3  ;;  %v773_v0 = vpop.f32.mrf.mxu2 }
 0x247   : > { %v799_v42 = vadd.f32 %v1876_v49, %v793_v61  ;;  %v798_v40 = vadd.f32 %v1875_v58, %v773_v0  ;;  %v3228_v49 = vld [vmem:[#allocation5 + $0x180] sm:$0xff]  ;;  %v3231_v61 = vld [vmem:[#allocation5 + $0x188] sm:$0xff] }
 0x248   : > { %v3252_v58 = vld [vmem:[#allocation5 + $0x140] sm:$0xff]  ;;  %v3255_v0 = vld [vmem:[#allocation5 + $0x148] sm:$0xff] }
 0x249   : > { %v1879_v53 = vmul.f32 -1.442695, %v799_v42  ;;  %v3234_v42 = vld [vmem:[#allocation5 + $0x190] sm:$0xff] }
 0x24a   : > { %v2061_v2 = vpop.eup %2060 }
 0x24b   : > { %v2063_v1 = vpop.eup %2062  ;;  %v803_v38 = vadd.f32 1.0, %v2061_v2  ;;  %2064 = vpow2.f32 %v1879_v53  ;;  %v3237_v53 = vld [vmem:[#allocation5 + $0x198] sm:$0xff]  ;;  %v3240_v2 = vld [vmem:[#allocation5 + $0x160] sm:$0xff] }
 0x24c   : > { %v822_v57 = vadd.f32 1.0, %v2063_v1  ;;  %v3243_v1 = vld [vmem:[#allocation5 + $0x168] sm:$0xff] }
 0x24d   : > { %2066 = vrcp.f32 %v803_v38  ;;  %v815_v36 = vand.u32 2147483648, %v803_v38  ;;  %v813_v51 = vand.u32 2147483647, %v803_v38  ;;  %vm809_vm12 = vweird.f32 %v803_v38 }
 0x24e   : > { %2068 = vrcp.f32 %v822_v57  ;;  %v834_v43 = vand.u32 2147483648, %v822_v57  ;;  %v832_v52 = vand.u32 2147483647, %v822_v57  ;;  %vm828_vm13 = vweird.f32 %v822_v57 }
 0x24f   : > { %v816_v3 = vor.u32 1.1754944e-38, %v815_v36  ;;  %vm814_vm0 = vcmp.eq.f32.partialorder %v813_v51, 8.507059e+37  ;;  %v3285_v36 = vld [vmem:[#allocation5 + $0x118] sm:$0xff]  ;;  %v3294_v51 = vld [vmem:[#allocation5 + $0xf0] sm:$0xff] }
 0x250   : > { %v835_v6 = vor.u32 1.1754944e-38, %v834_v43  ;;  %vm833_vm1 = vcmp.eq.f32.partialorder %v832_v52, 8.507059e+37  ;;  %v3288_v43 = vld [vmem:[#allocation5 + $0xe0] sm:$0xff] }
 0x251   : > { %v2065_v46 = vpop.eup %2064  ;;  %v3300_v52 = vld [vmem:[#allocation5 + $0xc0] sm:$0xff] }
 0x252   : > { %v842_v39 = vadd.f32 1.0, %v2065_v46  ;;  %v3258_v46 = vld [vmem:[#allocation5 + $0x150] sm:$0xff] }
 0x253   : > { %v2067_v47 = vpop.eup %2066 }
 0x254   : > { %v2069_v60 = vpop.eup %2068  ;;  %v805_v63 = vmul.f32 %v2067_v47, %v803_v38  ;;  %2070 = vrcp.f32 %v842_v39  ;;  %vm810_vm10 = vweird.f32 %v2067_v47  ;;  %v854_v19 = vand.u32 2147483648, %v842_v39  ;;  %v3246_v38 = vld [vmem:[#allocation5 + $0x170] sm:$0xff] }
 0x255   : > { %v824_v44 = vmul.f32 %v2069_v60, %v822_v57  ;;  %2072 = vtanh.f32 %v798_v40  ;;  %vm829_vm11 = vweird.f32 %v2069_v60  ;;  %vm811_vm14 = vmor %vm809_vm12, %vm810_vm10  ;;  %vm848_vm4 = vweird.f32 %v842_v39  ;;  %v3249_v57 = vld [vmem:[#allocation5 + $0x178] sm:$0xff]  ;;  %v3267_v40 = vld [vmem:[#allocation5 + $0x128] sm:$0xff] }
 0x256   : > { %v806_v59 = vsub.f32 1.0, %v805_v63  ;;  %vm830_vm15 = vmor %vm828_vm13, %vm829_vm11  ;;  %v852_v21 = vand.u32 2147483647, %v842_v39  ;;  %v855_v23 = vor.u32 1.1754944e-38, %v854_v19  ;;  %v3273_v63 = vld [vmem:[#allocation5 + $0x138] sm:$0xff] }
 0x257   : > { %v825_v55 = vsub.f32 1.0, %v824_v44  ;;  %v3276_v44 = vld [vmem:[#allocation5 + $0x100] sm:$0xff]  ;;  %v3357_v19 = vld [vmem:[#allocation5 + $0x58] sm:$0xff] }
 0x258   : > { %v807_v56 = vmul.f32 %v2067_v47, %v806_v59  ;;  %vm853_vm6 = vcmp.eq.f32.partialorder %v852_v21, 8.507059e+37  ;;  %v3279_v59 = vld [vmem:[#allocation5 + $0x108] sm:$0xff]  ;;  %3931 = vst [vmem:[#allocation32_spill] sm:$0xff] %v3357_v19  ;;  %v3360_v21 = vld [vmem:[#allocation5 + $0x20] sm:$0xff] }
 0x259   : > { %v826_v50 = vmul.f32 %v2069_v60, %v825_v55  ;;  %v3282_v55 = vld [vmem:[#allocation5 + $0x110] sm:$0xff]  ;;  %3932 = vst [vmem:[#allocation45_spill] sm:$0xff] %v3360_v21 }
 0x25a   : > { %v2071_v62 = vpop.eup %2070  ;;  %v808_v48 = vadd.f32 %v2067_v47, %v807_v56  ;;  %v3291_v56 = vld [vmem:[#allocation5 + $0xe8] sm:$0xff] }
 0x25b   : > { %v827_v4 = vadd.f32 %v2069_v60, %v826_v50  ;;  %v844_v5 = vmul.f32 %v2071_v62, %v842_v39  ;;  %v2073_v9 = vpop.eup %2072  ;;  %vm849_vm3 = vweird.f32 %v2071_v62  ;;  %v3261_v39 = vld [vmem:[#allocation5 + $0x158] sm:$0xff] }
 0x25c   : > { %v812_v7 = vsel %vm811_vm14, %v2067_v47, %v808_v48  ;;  %vm850_vm5 = vmor %vm848_vm4, %vm849_vm3  ;;  %v3264_v47 = vld [vmem:[#allocation5 + $0x120] sm:$0xff]  ;;  %v3297_v50 = vld [vmem:[#allocation5 + $0xf8] sm:$0xff] }
 0x25d   : > { %v817_v10 = vsel %vm814_vm0, %v816_v3, %v812_v7  ;;  %v831_v11 = vsel %vm830_vm15, %v2069_v60, %v827_v4  ;;  %v845_v12 = vsub.f32 1.0, %v844_v5  ;;  %v3270_v60 = vld [vmem:[#allocation5 + $0x130] sm:$0xff]  ;;  %v3309_v3 = vld [vmem:[#allocation5 + $0xd8] sm:$0xff]  ;;  %v3312_v4 = vld [vmem:[#allocation5 + $0xa0] sm:$0xff] }
 0x25e   : > { %v836_v13 = vsel %vm833_vm1, %v835_v6, %v831_v11  ;;  %v859_v14 = vmul.f32 %v2073_v9, %v817_v10  ;;  %v3306_v48 = vld [vmem:[#allocation5 + $0xd0] sm:$0xff]  ;;  %3915 = vst [vmem:[#allocation20_spill] sm:$0xff] %v3309_v3  ;;  %v3315_v5 = vld [vmem:[#allocation5 + $0xa8] sm:$0xff]  ;;  %v3321_v7 = vld [vmem:[#allocation5 + $0xb8] sm:$0xff] }
 0x25f   : > { %v858_v15 = vmul.f32 %v836_v13, %v3090_v54  ;;  %v846_v16 = vmul.f32 %v2071_v62, %v845_v12  ;;  %3914 = vst [vmem:[#allocation42_spill] sm:$0xff] %v3306_v48  ;;  %v3318_v6 = vld [vmem:[#allocation5 + $0xb0] sm:$0xff]  ;;  %v3327_v9 = vld [vmem:[#allocation5 + $0x88] sm:$0xff]  ;;  %v3333_v11 = vld [vmem:[#allocation5 + $0x98] sm:$0xff] }
 0x260   : > { %3916 = vst [vmem:[#allocation34_spill] sm:$0xff] %v3312_v4  ;;  %v3330_v10 = vld [vmem:[#allocation5 + $0x90] sm:$0xff]  ;;  %v3336_v12 = vld [vmem:[#allocation5 + $0x60] sm:$0xff]  ;;  %v3339_v13 = vld [vmem:[#allocation5 + $0x68] sm:$0xff] }
 0x261   : > { %v860_v17 = vadd.f32 %v859_v14, %v858_v15  ;;  %v847_v18 = vadd.f32 %v2071_v62, %v846_v16  ;;  %3917 = vst [vmem:[#allocation21_spill] sm:$0xff] %v3315_v5  ;;  %v3342_v14 = vld [vmem:[#allocation5 + $0x70] sm:$0xff]  ;;  %v3345_v15 = vld [vmem:[#allocation5 + $0x78] sm:$0xff]  ;;  %v3348_v16 = vld [vmem:[#allocation5 + $0x40] sm:$0xff] }
 0x262   : > { %3918 = vst [vmem:[#allocation22_spill] sm:$0xff] %v3318_v6 }
 0x263   : > { %2074 = vtanh.f32 %v860_v17  ;;  %v3180_v20 = vsel %vm867_vm2, %v860_v17, %v3090_v54  ;;  %v851_v22 = vsel %vm850_vm5, %v2071_v62, %v847_v18  ;;  %v3192_v54 = vld [vmem:[#allocation5 + $0x1e0] sm:$0xff]  ;;  %v3303_v62 = vld [vmem:[#allocation5 + $0xc8] sm:$0xff]  ;;  %3919 = vst [vmem:[#allocation23_spill] sm:$0xff] %v3321_v7  ;;  %v3354_v18 = vld [vmem:[#allocation5 + $0x50] sm:$0xff] }
 0x264   : > { %v856_v25 = vsel %vm853_vm6, %v855_v23, %v851_v22  ;;  %3913 = vst [vmem:[#allocation19_spill] sm:$0xff] %v3303_v62  ;;  %v3351_v17 = vld [vmem:[#allocation5 + $0x48] sm:$0xff]  ;;  %v3366_v23 = vld [vmem:[#allocation5 + $0x30] sm:$0xff] }
 0x265   : > { %3921 = vst [vmem:[#allocation24_spill] sm:$0xff] %v3327_v9  ;;  %v3363_v22 = vld [vmem:[#allocation5 + $0x28] sm:$0xff] }
 0x266   : > { %3922 = vst [vmem:[#allocation25_spill] sm:$0xff] %v3330_v10 }
 0x267   : > { %3923 = vst [vmem:[#allocation26_spill] sm:$0xff] %v3333_v11 }
 0x268   : > { %3924 = vst [vmem:[#allocation43_spill] sm:$0xff] %v3336_v12 }
 0x269   : > { %v2075_v24 = vpop.eup %2074  ;;  %3925 = vst [vmem:[#allocation27_spill] sm:$0xff] %v3339_v13 }
 0x26a   : > { %v862_v26 = vmul.f32 %v2075_v24, %v856_v25  ;;  %3926 = vst [vmem:[#allocation28_spill] sm:$0xff] %v3342_v14  ;;  %v3369_v24 = vld [vmem:[#allocation5 + $0x38] sm:$0xff]  ;;  %v3372_v25 = vld [vmem:[#allocation5] sm:$0xff] }
 0x26b   : > { %3927 = vst [vmem:[#allocation29_spill] sm:$0xff] %v3345_v15 }
 0x26c   : > { %v3184_v27 = vsel %vm867_vm2, %v862_v26, %v3094_v35  ;;  %v3198_v35 = vld [vmem:[#allocation5 + $0x1f0] sm:$0xff]  ;;  %3928 = vst [vmem:[#allocation44_spill] sm:$0xff] %v3348_v16  ;;  %v3375_v26 = vld [vmem:[#allocation5 + $0x8] sm:$0xff] }
 0x26d   : > { %1880 = vst [vmem:[%s2655_s26 + $0x10] sm:$0xff] %v3184_v27  ;;  %893 = vmatmul.f32.vlgmr.msrb.gmra.mxu0 %v3184_v27  ;;  %913 = vmatmul.f32.vlgmr.msrb.gmra.mxu1 %v3184_v27 }
 0x26e   : > { %933 = vmatmul.f32.vlgmr.msrb.gmra.mxu2 %v3184_v27  ;;  %953 = vmatmul.f32.vlgmr.msrb.gmra.mxu3 %v3184_v27  ;;  %3929 = vst [vmem:[#allocation30_spill] sm:$0xff] %v3351_v17 }
 0x26f   : > { %1199 = vmatpush.msrb.mxu0 %v3192_v54  ;;  %1219 = vmatpush.msrb.mxu1 %v3195_v28  ;;  %3930 = vst [vmem:[#allocation31_spill] sm:$0xff] %v3354_v18 }
 0x270   : > { %1239 = vmatpush.msrb.mxu2 %v3198_v35  ;;  %1259 = vmatpush.msrb.mxu3 %v3201_v29  ;;  %3933 = vst [vmem:[#allocation33_spill] sm:$0xff] %v3363_v22 }
 0x271   : > { %1200 = vmatpush.msrb.mxu0 %v3204_v30  ;;  %1220 = vmatpush.msrb.mxu1 %v3207_v31  ;;  %3934 = vst [vmem:[#allocation35_spill] sm:$0xff] %v3366_v23 }
 0x272   : > { %1240 = vmatpush.msrb.mxu2 %v3210_v32  ;;  %1260 = vmatpush.msrb.mxu3 %v3213_v33  ;;  %3935 = vst [vmem:[#allocation36_spill] sm:$0xff] %v3369_v24 }
 0x273   : > { %1201 = vmatpush.msrb.mxu0 %v3216_v34  ;;  %1221 = vmatpush.msrb.mxu1 %v3219_v37  ;;  %3936 = vst [vmem:[#allocation46_spill] sm:$0xff] %v3372_v25 }
 0x274   : > { %1241 = vmatpush.msrb.mxu2 %v3222_v41  ;;  %1261 = vmatpush.msrb.mxu3 %v3225_v45  ;;  %3937 = vst [vmem:[#allocation37_spill] sm:$0xff] %v3375_v26 }
 0x275   : > { %1202 = vmatpush.msrb.mxu0 %v3228_v49  ;;  %1222 = vmatpush.msrb.mxu1 %v3231_v61 }
 0x276   : > { %1242 = vmatpush.msrb.mxu2 %v3234_v42  ;;  %1262 = vmatpush.msrb.mxu3 %v3237_v53 }
 0x277   : > { %1203 = vmatpush.msrb.mxu0 %v3240_v2  ;;  %1223 = vmatpush.msrb.mxu1 %v3243_v1 }
 0x278   : > { %1243 = vmatpush.msrb.mxu2 %v3246_v38  ;;  %1263 = vmatpush.msrb.mxu3 %v3249_v57 }
 0x279   : > { %1204 = vmatpush.msrb.mxu0 %v3252_v58  ;;  %1224 = vmatpush.msrb.mxu1 %v3255_v0 }
 0x27a   : > { %1244 = vmatpush.msrb.mxu2 %v3258_v46  ;;  %1264 = vmatpush.msrb.mxu3 %v3261_v39 }
 0x27b   : > { %1205 = vmatpush.msrb.mxu0 %v3264_v47  ;;  %1225 = vmatpush.msrb.mxu1 %v3267_v40 }
 0x27c   : > { %1245 = vmatpush.msrb.mxu2 %v3270_v60  ;;  %1265 = vmatpush.msrb.mxu3 %v3273_v63 }
 0x27d   : > { %1206 = vmatpush.msrb.mxu0 %v3276_v44  ;;  %1226 = vmatpush.msrb.mxu1 %v3279_v59 }
 0x27e   : > { %1246 = vmatpush.msrb.mxu2 %v3282_v55  ;;  %1266 = vmatpush.msrb.mxu3 %v3285_v36 }
 0x27f   : > { %1207 = vmatpush.msrb.mxu0 %v3288_v43  ;;  %1227 = vmatpush.msrb.mxu1 %v3291_v56 }
 0x280   : > { %1247 = vmatpush.msrb.mxu2 %v3294_v51  ;;  %1267 = vmatpush.msrb.mxu3 %v3297_v50 }
 0x281   : > { %1208 = vmatpush.msrb.mxu0 %v3300_v52  ;;  %1228 = vmatpush.msrb.mxu1 %v3303_v62 }
 0x282   : > { %1248 = vmatpush.msrb.mxu2 %v3306_v48  ;;  %1268 = vmatpush.msrb.mxu3 %v3309_v3 }
 0x283   : > { %1209 = vmatpush.msrb.mxu0 %v3312_v4  ;;  %1229 = vmatpush.msrb.mxu1 %v3315_v5 }
 0x284   : > { %1249 = vmatpush.msrb.mxu2 %v3318_v6  ;;  %1269 = vmatpush.msrb.mxu3 %v3321_v7 }
 0x285   : > { %1210 = vmatpush.msrb.mxu0 %v3324_v8  ;;  %1230 = vmatpush.msrb.mxu1 %v3327_v9  ;;  %v1883_v9 = vld [vmem:[%s2640_s11 + $0x70] sm:$0xff] }
 0x286   : > { %1250 = vmatpush.msrb.mxu2 %v3330_v10  ;;  %1270 = vmatpush.msrb.mxu3 %v3333_v11 }
 0x287   : > { %1211 = vmatpush.msrb.mxu0 %v3336_v12  ;;  %1231 = vmatpush.msrb.mxu1 %v3339_v13 }
 0x288   : > { %1251 = vmatpush.msrb.mxu2 %v3342_v14  ;;  %1271 = vmatpush.msrb.mxu3 %v3345_v15 }
 0x289   : > { %1212 = vmatpush.msrb.mxu0 %v3348_v16  ;;  %1232 = vmatpush.msrb.mxu1 %v3351_v17 }
 0x28a   : > { %1252 = vmatpush.msrb.mxu2 %v3354_v18  ;;  %1272 = vmatpush.msrb.mxu3 %v3357_v19  ;;  %v1882_v19 = vld [vmem:[%s2640_s11 + $0x68] sm:$0xff] }
 0x28b   : > { %1213 = vmatpush.msrb.mxu0 %v3360_v21  ;;  %1233 = vmatpush.msrb.mxu1 %v3363_v22  ;;  %v3378_v21 = vld [vmem:[#allocation5 + $0x10] sm:$0xff]  ;;  %v3381_v22 = vld [vmem:[#allocation5 + $0x18] sm:$0xff] }
 0x28c   : > { %1253 = vmatpush.msrb.mxu2 %v3366_v23  ;;  %1273 = vmatpush.msrb.mxu3 %v3369_v24  ;;  %3938 = vst [vmem:[#allocation39_spill] sm:$0xff] %v3378_v21  ;;  %v1881_v23 = vld [vmem:[%s2640_s11 + $0x60] sm:$0xff] }
 0x28d   : > { %1214 = vmatpush.msrb.mxu0 %v3372_v25  ;;  %1234 = vmatpush.msrb.mxu1 %v3375_v26  ;;  %3939 = vst [vmem:[#allocation40_spill] sm:$0xff] %v3381_v22  ;;  %v1884_v26 = vld [vmem:[%s2640_s11 + $0x78] sm:$0xff] }
 0x28e   : > { %1254 = vmatpush.msrb.mxu2 %v3378_v21  ;;  %1274 = vmatpush.msrb.mxu3 %v3381_v22 }
 0x2ea   : > { %v894_v24 = vpop.f32.mrf.mxu0  ;;  %v914_v18 = vpop.f32.mrf.mxu1 }
 0x2eb   : > { %v957_v17 = vadd.f32 %v1881_v23, %v894_v24  ;;  %v958_v16 = vadd.f32 %v1882_v19, %v914_v18 }
 0x2ed   : > { %v1885_v25 = vmul.f32 -1.442695, %v957_v17  ;;  %v1886_v15 = vmul.f32 -1.442695, %v958_v16 }
 0x2ef   : > { %2076 = vpow2.f32 %v1885_v25 }
 0x2f0   : > { %2078 = vpow2.f32 %v1886_v15 }
 0x2f1   : > { %v954_v14 = vpop.f32.mrf.mxu3  ;;  %v934_v23 = vpop.f32.mrf.mxu2 }
 0x2f2   : > { %v960_v13 = vadd.f32 %v1884_v26, %v954_v14  ;;  %v959_v19 = vadd.f32 %v1883_v9, %v934_v23 }
 0x2f4   : > { %v1887_v21 = vmul.f32 -1.442695, %v960_v13 }
 0x2f5   : > { %v2077_v12 = vpop.eup %2076 }
 0x2f6   : > { %v2079_v11 = vpop.eup %2078  ;;  %v964_v10 = vadd.f32 1.0, %v2077_v12  ;;  %2080 = vpow2.f32 %v1887_v21 }
 0x2f7   : > { %v983_v22 = vadd.f32 1.0, %v2079_v11 }
 0x2f8   : > { %2082 = vrcp.f32 %v964_v10  ;;  %v976_v14 = vand.u32 2147483648, %v964_v10  ;;  %v974_v26 = vand.u32 2147483647, %v964_v10  ;;  %vm970_vm9 = vweird.f32 %v964_v10 }
 0x2f9   : > { %2084 = vrcp.f32 %v983_v22  ;;  %v995_v15 = vand.u32 2147483648, %v983_v22  ;;  %v993_v23 = vand.u32 2147483647, %v983_v22  ;;  %vm989_vm10 = vweird.f32 %v983_v22 }
 0x2fa   : > { %v977_v7 = vor.u32 1.1754944e-38, %v976_v14  ;;  %vm975_vm13 = vcmp.eq.f32.partialorder %v974_v26, 8.507059e+37  ;;  %v3946_v26 = vld [vmem:[#allocation22_spill] sm:$0xff] }
 0x2fb   : > { %vm994_vm14 = vcmp.eq.f32.partialorder %v993_v23, 8.507059e+37  ;;  %v3948_v23 = vld [vmem:[#allocation38_spill] sm:$0xff] }
 0x2fc   : > { %v2081_v18 = vpop.eup %2080 }
 0x2fd   : > { %v1003_v17 = vadd.f32 1.0, %v2081_v18 }
 0x2fe   : > { %v2083_v16 = vpop.eup %2082 }
 0x2ff   : > { %v2085_v24 = vpop.eup %2084  ;;  %v966_v25 = vmul.f32 %v2083_v16, %v964_v10  ;;  %2086 = vrcp.f32 %v1003_v17  ;;  %vm971_vm7 = vweird.f32 %v2083_v16  ;;  %vm1009_vm1 = vweird.f32 %v1003_v17 }
 0x300   : > { %v985_v12 = vmul.f32 %v2085_v24, %v983_v22  ;;  %2088 = vtanh.f32 %v959_v19  ;;  %vm990_vm8 = vweird.f32 %v2085_v24  ;;  %vm972_vm11 = vmor %vm970_vm9, %vm971_vm7 }
 0x301   : > { %v967_v13 = vsub.f32 1.0, %v966_v25  ;;  %vm991_vm12 = vmor %vm989_vm10, %vm990_vm8 }
 0x302   : > { %v986_v11 = vsub.f32 1.0, %v985_v12  ;;  %v996_v12 = vor.u32 1.1754944e-38, %v995_v15  ;;  %v1015_v15 = vand.u32 2147483648, %v1003_v17 }
 0x303   : > { %v968_v21 = vmul.f32 %v2083_v16, %v967_v13  ;;  %v1027_v13 = vstv %s1026_s16  ;;  %s2482_s16 = smov [#allocation13]  }
 0x304   : > { %v987_v9 = vmul.f32 %v2085_v24, %v986_v11  ;;  %vm1028_vm15 = vcmp.eq.s32.totalorder %v1027_v13, 1  ;;  %v3953_v13 = vld [vmem:[#allocation27_spill] sm:$0xff] }
 0x305   : > { %v2087_v18 = vpop.eup %2086  ;;  %v969_v8 = vadd.f32 %v2083_v16, %v968_v21 }
 0x306   : > { %v988_v6 = vadd.f32 %v2085_v24, %v987_v9  ;;  %v1005_v25 = vmul.f32 %v2087_v18, %v1003_v17  ;;  %v2089_v5 = vpop.eup %2088  ;;  %vm1010_vm0 = vweird.f32 %v2087_v18  ;;  %v3947_v9 = vld [vmem:[#allocation23_spill] sm:$0xff] }
 0x307   : > { %v973_v19 = vsel %vm972_vm11, %v2083_v16, %v969_v8  ;;  %vm1011_vm2 = vmor %vm1009_vm1, %vm1010_vm0  ;;  %v3944_v16 = vld [vmem:[#allocation34_spill] sm:$0xff] }
 0x308   : > { %v978_v4 = vsel %vm975_vm13, %v977_v7, %v973_v19  ;;  %v992_v3 = vsel %vm991_vm12, %v2085_v24, %v988_v6  ;;  %v1006_v11 = vsub.f32 1.0, %v1005_v25  ;;  %v1013_v6 = vand.u32 2147483647, %v1003_v17  ;;  %v3943_v17 = vld [vmem:[#allocation20_spill] sm:$0xff]  ;;  %v3945_v24 = vld [vmem:[#allocation21_spill] sm:$0xff]  ;;  %v3952_v19 = vld [vmem:[#allocation43_spill] sm:$0xff] }
 0x309   : > { %v997_v48 = vsel %vm994_vm14, %v996_v12, %v992_v3  ;;  %v1020_v62 = vmul.f32 %v2089_v5, %v978_v4  ;;  %v1016_v3 = vor.u32 1.1754944e-38, %v1015_v15  ;;  %v3950_v25 = vld [vmem:[#allocation25_spill] sm:$0xff]  ;;  %v3951_v12 = vld [vmem:[#allocation26_spill] sm:$0xff]  ;;  %v3959_v15 = vld [vmem:[#allocation32_spill] sm:$0xff] }
 0x30a   : > { %v1019_v21 = vmul.f32 %v997_v48, %v3180_v20  ;;  %v1007_v10 = vmul.f32 %v2087_v18, %v1006_v11  ;;  %vm1014_vm3 = vcmp.eq.f32.partialorder %v1013_v6, 8.507059e+37  ;;  %v3954_v11 = vld [vmem:[#allocation28_spill] sm:$0xff]  ;;  %v3960_v6 = vld [vmem:[#allocation45_spill] sm:$0xff] }
 0x30c   : > { %v1021_v22 = vadd.f32 %v1020_v62, %v1019_v21  ;;  %v1008_v14 = vadd.f32 %v2087_v18, %v1007_v10  ;;  %v3955_v21 = vld [vmem:[#allocation29_spill] sm:$0xff]  ;;  %v3956_v10 = vld [vmem:[#allocation44_spill] sm:$0xff] }
 0x30e   : > { %2090 = vtanh.f32 %v1021_v22  ;;  %v3398_v8 = vsel %vm1028_vm15, %v1021_v22, %v3180_v20  ;;  %v1012_v7 = vsel %vm1011_vm2, %v2087_v18, %v1008_v14  ;;  %v3941_v20 = vld [vmem:[#allocation19_spill] sm:$0xff]  ;;  %v3949_v18 = vld [vmem:[#allocation24_spill] sm:$0xff]  ;;  %v3957_v22 = vld [vmem:[#allocation30_spill] sm:$0xff] }
 0x30f   : > { %v1017_v48 = vsel %vm1014_vm3, %v1016_v3, %v1012_v7  ;;  %v3958_v14 = vld [vmem:[#allocation31_spill] sm:$0xff]  ;;  %v3961_v7 = vld [vmem:[#allocation33_spill] sm:$0xff] }
 0x310   : > { %v3962_v3 = vld [vmem:[#allocation35_spill] sm:$0xff] }
 0x314   : > { %v2091_v4 = vpop.eup %2090 }
 0x315   : > { %v1023_v5 = vmul.f32 %v2091_v4, %v1017_v48  ;;  %v3963_v4 = vld [vmem:[#allocation36_spill] sm:$0xff]  ;;  %v3964_v48 = vld [vmem:[#allocation46_spill] sm:$0xff] }
 0x317   : > { %v3402_v62 = vsel %vm1028_vm15, %v1023_v5, %v3184_v27  ;;  %v3942_v27 = vld [vmem:[#allocation42_spill] sm:$0xff]  ;;  %v3965_v5 = vld [vmem:[#allocation37_spill] sm:$0xff] }
 0x318   : > { %1888 = vst [vmem:[%s2655_s26 + $0x18] sm:$0xff] %v3402_v62  ;;  %1054 = vmatmul.f32.vlgmr.msra.gmra.mxu0 %v3402_v62  ;;  %1074 = vmatmul.f32.vlgmr.msra.gmra.mxu1 %v3402_v62 }
 0x319   : > { %1094 = vmatmul.f32.vlgmr.msra.gmra.mxu2 %v3402_v62  ;;  %1114 = vmatmul.f32.vlgmr.msra.gmra.mxu3 %v3402_v62 }
 0x31a   : > { %1360 = vmatpush.msra.mxu0 %v3192_v54  ;;  %1380 = vmatpush.msra.mxu1 %v3195_v28 }
 0x31b   : > { %1400 = vmatpush.msra.mxu2 %v3198_v35  ;;  %1420 = vmatpush.msra.mxu3 %v3201_v29 }
 0x31c   : > { %1361 = vmatpush.msra.mxu0 %v3204_v30  ;;  %1381 = vmatpush.msra.mxu1 %v3207_v31 }
 0x31d   : > { %1401 = vmatpush.msra.mxu2 %v3210_v32  ;;  %1421 = vmatpush.msra.mxu3 %v3213_v33 }
 0x31e   : > { %1362 = vmatpush.msra.mxu0 %v3216_v34  ;;  %1382 = vmatpush.msra.mxu1 %v3219_v37 }
 0x31f   : > { %1402 = vmatpush.msra.mxu2 %v3222_v41  ;;  %1422 = vmatpush.msra.mxu3 %v3225_v45 }
 0x320   : > { %1363 = vmatpush.msra.mxu0 %v3228_v49  ;;  %1383 = vmatpush.msra.mxu1 %v3231_v61 }
 0x321   : > { %1403 = vmatpush.msra.mxu2 %v3234_v42  ;;  %1423 = vmatpush.msra.mxu3 %v3237_v53 }
 0x322   : > { %1364 = vmatpush.msra.mxu0 %v3240_v2  ;;  %1384 = vmatpush.msra.mxu1 %v3243_v1 }
 0x323   : > { %1404 = vmatpush.msra.mxu2 %v3246_v38  ;;  %1424 = vmatpush.msra.mxu3 %v3249_v57 }
 0x324   : > { %1365 = vmatpush.msra.mxu0 %v3252_v58  ;;  %1385 = vmatpush.msra.mxu1 %v3255_v0 }
 0x325   : > { %1405 = vmatpush.msra.mxu2 %v3258_v46  ;;  %1425 = vmatpush.msra.mxu3 %v3261_v39 }
 0x326   : > { %1366 = vmatpush.msra.mxu0 %v3264_v47  ;;  %1386 = vmatpush.msra.mxu1 %v3267_v40 }
 0x327   : > { %1406 = vmatpush.msra.mxu2 %v3270_v60  ;;  %1426 = vmatpush.msra.mxu3 %v3273_v63 }
 0x328   : > { %1367 = vmatpush.msra.mxu0 %v3276_v44  ;;  %1387 = vmatpush.msra.mxu1 %v3279_v59 }
 0x329   : > { %1407 = vmatpush.msra.mxu2 %v3282_v55  ;;  %1427 = vmatpush.msra.mxu3 %v3285_v36 }
 0x32a   : > { %1368 = vmatpush.msra.mxu0 %v3288_v43  ;;  %1388 = vmatpush.msra.mxu1 %v3291_v56 }
 0x32b   : > { %1408 = vmatpush.msra.mxu2 %v3294_v51  ;;  %1428 = vmatpush.msra.mxu3 %v3297_v50 }
 0x32c   : > { %1369 = vmatpush.msra.mxu0 %v3300_v52  ;;  %1389 = vmatpush.msra.mxu1 %v3941_v20 }
 0x32d   : > { %1409 = vmatpush.msra.mxu2 %v3942_v27  ;;  %1429 = vmatpush.msra.mxu3 %v3943_v17 }
 0x32e   : > { %1370 = vmatpush.msra.mxu0 %v3944_v16  ;;  %1390 = vmatpush.msra.mxu1 %v3945_v24 }
 0x32f   : > { %1410 = vmatpush.msra.mxu2 %v3946_v26  ;;  %1430 = vmatpush.msra.mxu3 %v3947_v9 }
 0x330   : > { %1371 = vmatpush.msra.mxu0 %v3948_v23  ;;  %1391 = vmatpush.msra.mxu1 %v3949_v18  ;;  %v1891_v18 = vld [vmem:[%s2640_s11 + $0x90] sm:$0xff] }
 0x331   : > { %1411 = vmatpush.msra.mxu2 %v3950_v25  ;;  %1431 = vmatpush.msra.mxu3 %v3951_v12 }
 0x332   : > { %1372 = vmatpush.msra.mxu0 %v3952_v19  ;;  %1392 = vmatpush.msra.mxu1 %v3953_v13 }
 0x333   : > { %1412 = vmatpush.msra.mxu2 %v3954_v11  ;;  %1432 = vmatpush.msra.mxu3 %v3955_v21  ;;  %v1890_v21 = vld [vmem:[%s2640_s11 + $0x88] sm:$0xff] }
 0x334   : > { %1373 = vmatpush.msra.mxu0 %v3956_v10  ;;  %1393 = vmatpush.msra.mxu1 %v3957_v22  ;;  %v3966_v10 = vld [vmem:[#allocation39_spill] sm:$0xff]  ;;  %v3967_v22 = vld [vmem:[#allocation40_spill] sm:$0xff] }
 0x335   : > { %1413 = vmatpush.msra.mxu2 %v3958_v14  ;;  %1433 = vmatpush.msra.mxu3 %v3959_v15  ;;  %v1889_v14 = vld [vmem:[%s2640_s11 + $0x80] sm:$0xff] }
 0x336   : > { %1374 = vmatpush.msra.mxu0 %v3960_v6  ;;  %1394 = vmatpush.msra.mxu1 %v3961_v7 }
 0x337   : > { %1414 = vmatpush.msra.mxu2 %v3962_v3  ;;  %1434 = vmatpush.msra.mxu3 %v3963_v4  ;;  %v1892_v4 = vld [vmem:[%s2640_s11 + $0x98] sm:$0xff] }
 0x338   : > { %1375 = vmatpush.msra.mxu0 %v3964_v48  ;;  %1395 = vmatpush.msra.mxu1 %v3965_v5 }
 0x339   : > { %1415 = vmatpush.msra.mxu2 %v3966_v10  ;;  %1435 = vmatpush.msra.mxu3 %v3967_v22 }
 0x395   : > { %v1055_v15 = vpop.f32.mrf.mxu0  ;;  %v1075_v11 = vpop.f32.mrf.mxu1 }
 0x396   : > { %v1118_v6 = vadd.f32 %v1889_v14, %v1055_v15  ;;  %v1119_v13 = vadd.f32 %v1890_v21, %v1075_v11 }
 0x398   : > { %v1893_v7 = vmul.f32 -1.442695, %v1118_v6  ;;  %v1894_v19 = vmul.f32 -1.442695, %v1119_v13 }
 0x39a   : > { %2092 = vpow2.f32 %v1893_v7 }
 0x39b   : > { %2094 = vpow2.f32 %v1894_v19 }
 0x39c   : > { %v1115_v48 = vpop.f32.mrf.mxu3  ;;  %v1095_v14 = vpop.f32.mrf.mxu2 }
 0x39d   : > { %v1121_v3 = vadd.f32 %v1892_v4, %v1115_v48  ;;  %v1120_v15 = vadd.f32 %v1891_v18, %v1095_v14 }
 0x39f   : > { %v1895_v5 = vmul.f32 -1.442695, %v1121_v3 }
 0x3a0   : > { %v2093_v12 = vpop.eup %2092 }
 0x3a1   : > { %v2095_v10 = vpop.eup %2094  ;;  %v1125_v25 = vadd.f32 1.0, %v2093_v12  ;;  %2096 = vpow2.f32 %v1895_v5 }
 0x3a2   : > { %v1144_v22 = vadd.f32 1.0, %v2095_v10 }
 0x3a3   : > { %2098 = vrcp.f32 %v1125_v25  ;;  %v1137_v3 = vand.u32 2147483648, %v1125_v25  ;;  %v1135_v5 = vand.u32 2147483647, %v1125_v25  ;;  %vm1131_vm6 = vweird.f32 %v1125_v25 }
 0x3a4   : > { %2100 = vrcp.f32 %v1144_v22  ;;  %v1156_v4 = vand.u32 2147483648, %v1144_v22  ;;  %v1154_v14 = vand.u32 2147483647, %v1144_v22  ;;  %vm1150_vm7 = vweird.f32 %v1144_v22 }
 0x3a5   : > { %v1138_v9 = vor.u32 1.1754944e-38, %v1137_v3  ;;  %vm1136_vm10 = vcmp.eq.f32.partialorder %v1135_v5, 8.507059e+37 }
 0x3a6   : > { %vm1155_vm11 = vcmp.eq.f32.partialorder %v1154_v14, 8.507059e+37 }
 0x3a7   : > { %v2097_v11 = vpop.eup %2096 }
 0x3a8   : > { %v1164_v21 = vadd.f32 1.0, %v2097_v11 }
 0x3a9   : > { %v2099_v13 = vpop.eup %2098 }
 0x3aa   : > { %v2101_v6 = vpop.eup %2100  ;;  %v1127_v7 = vmul.f32 %v2099_v13, %v1125_v25  ;;  %2102 = vrcp.f32 %v1164_v21  ;;  %vm1132_vm4 = vweird.f32 %v2099_v13  ;;  %vm1170_vm14 = vweird.f32 %v1164_v21 }
 0x3ab   : > { %v1146_v12 = vmul.f32 %v2101_v6, %v1144_v22  ;;  %2104 = vtanh.f32 %v1120_v15  ;;  %vm1151_vm5 = vweird.f32 %v2101_v6  ;;  %vm1133_vm8 = vmor %vm1131_vm6, %vm1132_vm4 }
 0x3ac   : > { %v1128_v19 = vsub.f32 1.0, %v1127_v7  ;;  %vm1152_vm9 = vmor %vm1150_vm7, %vm1151_vm5 }
 0x3ad   : > { %v1147_v10 = vsub.f32 1.0, %v1146_v12  ;;  %v1157_v12 = vor.u32 1.1754944e-38, %v1156_v4  ;;  %v1176_v4 = vand.u32 2147483648, %v1164_v21 }
 0x3ae   : > { %v1129_v48 = vmul.f32 %v2099_v13, %v1128_v19  ;;  %v1188_v19 = vstv %s1187_s9  ;;  %s1691_s9 = scalar_lea.hbm %s3698_s4, %s1932_s27  ;;  %s2360_s27 = scalar_lea.hbm %s3698_s4, 128 }
 0x3af   : > { %v1148_v18 = vmul.f32 %v2101_v6, %v1147_v10  ;;  %vm1189_vm12 = vcmp.eq.s32.totalorder %v1188_v19, 1  ;;  %s1694_s18 = sshll.u32 %s1691_s9, 4  ;;  %s1680_s9 = scalar_lea.sflag [#allocation4], %s2636_s17  ;;  %s3642_s18 = int_to_ptr.hbm [resolvable:$true] %s1694_s18 }
 0x3b0   : > { %v2103_v11 = vpop.eup %2102  ;;  %v1130_v23 = vadd.f32 %v2099_v13, %v1129_v48 }
 0x3b1   : > { %v1149_v26 = vadd.f32 %v2101_v6, %v1148_v18  ;;  %v1166_v7 = vmul.f32 %v2103_v11, %v1164_v21  ;;  %v2105_v24 = vpop.eup %2104  ;;  %vm1171_vm13 = vweird.f32 %v2103_v11  ;;  %v1899_v18 = vld [vmem:[%s2640_s11 + $0xb0] sm:$0xff] }
 0x3b2   : > { %v1134_v15 = vsel %vm1133_vm8, %v2099_v13, %v1130_v23  ;;  %vm1172_vm15 = vmor %vm1170_vm14, %vm1171_vm13 }
 0x3b3   : > { %v1139_v16 = vsel %vm1136_vm10, %v1138_v9, %v1134_v15  ;;  %v1153_v17 = vsel %vm1152_vm9, %v2101_v6, %v1149_v26  ;;  %v1167_v10 = vsub.f32 1.0, %v1166_v7  ;;  %v1174_v26 = vand.u32 2147483647, %v1164_v21 }
 0x3b4   : > { %v1158_v27 = vsel %vm1155_vm11, %v1157_v12, %v1153_v17  ;;  %v1181_v20 = vmul.f32 %v2105_v24, %v1139_v16  ;;  %v1177_v17 = vor.u32 1.1754944e-38, %v1176_v4 }
 0x3b5   : > { %v1180_v48 = vmul.f32 %v1158_v27, %v3398_v8  ;;  %v1168_v25 = vmul.f32 %v2103_v11, %v1167_v10  ;;  %vm1175_vm0 = vcmp.eq.f32.partialorder %v1174_v26, 8.507059e+37 }
 0x3b7   : > { %v1182_v22 = vadd.f32 %v1181_v20, %v1180_v48  ;;  %v1169_v3 = vadd.f32 %v2103_v11, %v1168_v25 }
 0x3b9   : > { %2106 = vtanh.f32 %v1182_v22  ;;  %v3488_v23 = vsel %vm1189_vm12, %v1182_v22, %v3398_v8  ;;  %v1173_v9 = vsel %vm1172_vm15, %v2103_v11, %v1169_v3 }
 0x3ba   : > { %v1178_v27 = vsel %vm1175_vm0, %v1177_v17, %v1173_v9 }
 0x3bf   : > { %v2107_v16 = vpop.eup %2106 }
 0x3c0   : > { %v1184_v24 = vmul.f32 %v2107_v16, %v1178_v27 }
 0x3c2   : > { %v3492_v20 = vsel %vm1189_vm12, %v1184_v24, %v3402_v62 }
 0x3c3   : > { %1896 = vst [vmem:[%s2655_s26 + $0x20] sm:$0xff] %v3492_v20  ;;  %1215 = vmatmul.f32.vlgmr.msrb.gmra.mxu0 %v3492_v20  ;;  %1235 = vmatmul.f32.vlgmr.msrb.gmra.mxu1 %v3492_v20 }
 0x3c4   : > { %1255 = vmatmul.f32.vlgmr.msrb.gmra.mxu2 %v3492_v20  ;;  %1275 = vmatmul.f32.vlgmr.msrb.gmra.mxu3 %v3492_v20 }
 0x3c5   : > { %1521 = vmatpush.msrb.mxu0 %v3192_v54  ;;  %1541 = vmatpush.msrb.mxu1 %v3195_v28  ;;  %v3969_v54 = vld [vmem:[#allocation19_spill] sm:$0xff]  ;;  %v3970_v28 = vld [vmem:[#allocation42_spill] sm:$0xff] }
 0x3c6   : > { %1561 = vmatpush.msrb.mxu2 %v3198_v35  ;;  %1581 = vmatpush.msrb.mxu3 %v3201_v29  ;;  %v3971_v35 = vld [vmem:[#allocation20_spill] sm:$0xff]  ;;  %v3972_v29 = vld [vmem:[#allocation34_spill] sm:$0xff] }
 0x3c7   : > { %1522 = vmatpush.msrb.mxu0 %v3204_v30  ;;  %1542 = vmatpush.msrb.mxu1 %v3207_v31  ;;  %v3973_v30 = vld [vmem:[#allocation21_spill] sm:$0xff]  ;;  %v3974_v31 = vld [vmem:[#allocation22_spill] sm:$0xff] }
 0x3c8   : > { %1562 = vmatpush.msrb.mxu2 %v3210_v32  ;;  %1582 = vmatpush.msrb.mxu3 %v3213_v33  ;;  %v3975_v32 = vld [vmem:[#allocation23_spill] sm:$0xff]  ;;  %v3976_v33 = vld [vmem:[#allocation38_spill] sm:$0xff] }
 0x3c9   : > { %1523 = vmatpush.msrb.mxu0 %v3216_v34  ;;  %1543 = vmatpush.msrb.mxu1 %v3219_v37  ;;  %v3977_v34 = vld [vmem:[#allocation24_spill] sm:$0xff]  ;;  %v3978_v37 = vld [vmem:[#allocation25_spill] sm:$0xff] }
 0x3ca   : > { %1563 = vmatpush.msrb.mxu2 %v3222_v41  ;;  %1583 = vmatpush.msrb.mxu3 %v3225_v45  ;;  %v3979_v41 = vld [vmem:[#allocation26_spill] sm:$0xff]  ;;  %v3980_v45 = vld [vmem:[#allocation43_spill] sm:$0xff] }
 0x3cb   : > { %1524 = vmatpush.msrb.mxu0 %v3228_v49  ;;  %1544 = vmatpush.msrb.mxu1 %v3231_v61  ;;  %v3981_v49 = vld [vmem:[#allocation27_spill] sm:$0xff]  ;;  %v3982_v61 = vld [vmem:[#allocation28_spill] sm:$0xff] }
 0x3cc   : > { %1564 = vmatpush.msrb.mxu2 %v3234_v42  ;;  %1584 = vmatpush.msrb.mxu3 %v3237_v53  ;;  %v3983_v42 = vld [vmem:[#allocation29_spill] sm:$0xff]  ;;  %v3984_v53 = vld [vmem:[#allocation44_spill] sm:$0xff] }
 0x3cd   : > { %1525 = vmatpush.msrb.mxu0 %v3240_v2  ;;  %1545 = vmatpush.msrb.mxu1 %v3243_v1  ;;  %v3985_v2 = vld [vmem:[#allocation30_spill] sm:$0xff]  ;;  %v3986_v1 = vld [vmem:[#allocation31_spill] sm:$0xff] }
 0x3ce   : > { %1565 = vmatpush.msrb.mxu2 %v3246_v38  ;;  %1585 = vmatpush.msrb.mxu3 %v3249_v57  ;;  %v3987_v38 = vld [vmem:[#allocation32_spill] sm:$0xff]  ;;  %v3988_v57 = vld [vmem:[#allocation45_spill] sm:$0xff] }
 0x3cf   : > { %1526 = vmatpush.msrb.mxu0 %v3252_v58  ;;  %1546 = vmatpush.msrb.mxu1 %v3255_v0  ;;  %v3989_v58 = vld [vmem:[#allocation33_spill] sm:$0xff]  ;;  %v3990_v0 = vld [vmem:[#allocation35_spill] sm:$0xff] }
 0x3d0   : > { %1566 = vmatpush.msrb.mxu2 %v3258_v46  ;;  %1586 = vmatpush.msrb.mxu3 %v3261_v39  ;;  %v3991_v46 = vld [vmem:[#allocation36_spill] sm:$0xff]  ;;  %v3992_v39 = vld [vmem:[#allocation46_spill] sm:$0xff] }
 0x3d1   : > { %1527 = vmatpush.msrb.mxu0 %v3264_v47  ;;  %1547 = vmatpush.msrb.mxu1 %v3267_v40  ;;  %v3993_v47 = vld [vmem:[#allocation37_spill] sm:$0xff]  ;;  %v3994_v40 = vld [vmem:[#allocation39_spill] sm:$0xff] }
 0x3d2   : > { %1567 = vmatpush.msrb.mxu2 %v3270_v60  ;;  %1587 = vmatpush.msrb.mxu3 %v3273_v63  ;;  %v3995_v60 = vld [vmem:[#allocation40_spill] sm:$0xff]  ;;  %v1897_v63 = vld [vmem:[%s2640_s11 + $0xa0] sm:$0xff] }
 0x3d3   : > { %1528 = vmatpush.msrb.mxu0 %v3276_v44  ;;  %1548 = vmatpush.msrb.mxu1 %v3279_v59  ;;  %v1898_v44 = vld [vmem:[%s2640_s11 + $0xa8] sm:$0xff] }
 0x3d4   : > { %1568 = vmatpush.msrb.mxu2 %v3282_v55  ;;  %1588 = vmatpush.msrb.mxu3 %v3285_v36 }
 0x3d5   : > { %1529 = vmatpush.msrb.mxu0 %v3288_v43  ;;  %1549 = vmatpush.msrb.mxu1 %v3291_v56 }
 0x3d6   : > { %1569 = vmatpush.msrb.mxu2 %v3294_v51  ;;  %1589 = vmatpush.msrb.mxu3 %v3297_v50  ;;  %v1900_v50 = vld [vmem:[%s2640_s11 + $0xb8] sm:$0xff] }
 0x3d7   : > { %1530 = vmatpush.msrb.mxu0 %v3300_v52  ;;  %1550 = vmatpush.msrb.mxu1 %v3969_v54 }
 0x3d8   : > { %1570 = vmatpush.msrb.mxu2 %v3970_v28  ;;  %1590 = vmatpush.msrb.mxu3 %v3971_v35 }
 0x3d9   : > { %1531 = vmatpush.msrb.mxu0 %v3972_v29  ;;  %1551 = vmatpush.msrb.mxu1 %v3973_v30 }
 0x3da   : > { %1571 = vmatpush.msrb.mxu2 %v3974_v31  ;;  %1591 = vmatpush.msrb.mxu3 %v3975_v32  ;;  %v1349_v31 = vstv %s1348_s19  ;;  %s2481_s19 = smov [#allocation11]  }
 0x3db   : > { %1532 = vmatpush.msrb.mxu0 %v3976_v33  ;;  %1552 = vmatpush.msrb.mxu1 %v3977_v34  ;;  %vm1350_vm9 = vcmp.eq.s32.totalorder %v1349_v31, 1  ;;  %s3635_s20 = sshll.u32 %s2481_s19, 4  ;;  %s2354_s19 = sshra.s32 %s3642_s18, 4  ;;  %s1708_s20 = int_to_ptr.vmem [resolvable:$true] %s3635_s20  ;;  %s2355_s19 = int_to_ptr.hbm [resolvable:$true] %s2354_s19 }
 0x3dc   : > { %1572 = vmatpush.msrb.mxu2 %v3978_v37  ;;  %1592 = vmatpush.msrb.mxu3 %v3979_v41  ;;  %s2356_s14 = scalar_lea.hbm %s2355_s19, 64  ;;  %p2361_p2 = scmp.lt.s32.totalorder %s2355_s19, %s3698_s4 }
 0x3dd   : > { %1533 = vmatpush.msrb.mxu0 %v3980_v45  ;;  %1553 = vmatpush.msrb.mxu1 %v3981_v49  ;;  %p2357_p3 = scmp.ne.s32.totalorder %s2355_s19, %s2356_s14  ;;  %p2362_p1 = scmp.lt.s32.totalorder %s2360_s27, %s2356_s14 }
 0x3de   : > { %1573 = vmatpush.msrb.mxu2 %v3982_v61  ;;  %1593 = vmatpush.msrb.mxu3 %v3983_v42 }
 0x3df   : > { %1534 = vmatpush.msrb.mxu0 %v3984_v53  ;;  %1554 = vmatpush.msrb.mxu1 %v3985_v2  ;;  %p2358_p7 = pnand %p2357_p3, %p2606_p5  ;;  %p2363_p4 = por %p2362_p1, %p2361_p2 }
 0x3e0   : > { %1574 = vmatpush.msrb.mxu2 %v3986_v1  ;;  %1594 = vmatpush.msrb.mxu3 %v3987_v38 }
 0x3e1   : > { %1535 = vmatpush.msrb.mxu0 %v3988_v57  ;;  %1555 = vmatpush.msrb.mxu1 %v3989_v58  ;;  %p2359_p10 = pneg %p2358_p7 }
 0x3e2   : > { %1575 = vmatpush.msrb.mxu2 %v3990_v0  ;;  %1595 = vmatpush.msrb.mxu3 %v3991_v46 }
 0x3e3   : > { %1536 = vmatpush.msrb.mxu0 %v3992_v39  ;;  %1556 = vmatpush.msrb.mxu1 %v3993_v47  ;;  %p2364_p8 = pnand %p2363_p4, %p2359_p10 }
 0x3e4   : > { %1576 = vmatpush.msrb.mxu2 %v3994_v40  ;;  %1596 = vmatpush.msrb.mxu3 %v3995_v60  ;;  %v1906_v40 = vld [vmem:[%s2640_s11 + $0xc8] sm:$0xff] }
 0x440   : > { %v1216_v59 = vpop.f32.mrf.mxu0  ;;  %v1236_v55 = vpop.f32.mrf.mxu1 }
 0x441   : > { %v1279_v36 = vadd.f32 %v1897_v63, %v1216_v59  ;;  %v1280_v43 = vadd.f32 %v1898_v44, %v1236_v55 }
 0x443   : > { %v1901_v56 = vmul.f32 -1.442695, %v1279_v36  ;;  %v1902_v51 = vmul.f32 -1.442695, %v1280_v43  ;;  %v1908_v36 = vld [vmem:[%s2640_s11 + $0xd8] sm:$0xff] }
 0x445   : > { %2108 = vpow2.f32 %v1901_v56 }
 0x446   : > { %2110 = vpow2.f32 %v1902_v51 }
 0x447   : > { %v1276_v52 = vpop.f32.mrf.mxu3  ;;  %v1256_v14 = vpop.f32.mrf.mxu2 }
 0x448   : > { %v1282_v8 = vadd.f32 %v1900_v50, %v1276_v52  ;;  %v1281_v15 = vadd.f32 %v1899_v18, %v1256_v14 }
 0x44a   : > { %v1903_v62 = vmul.f32 -1.442695, %v1282_v8 }
 0x44b   : > { %v2109_v21 = vpop.eup %2108 }
 0x44c   : > { %v2111_v13 = vpop.eup %2110  ;;  %v1286_v6 = vadd.f32 1.0, %v2109_v21  ;;  %2112 = vpow2.f32 %v1903_v62  ;;  %v1907_v21 = vld [vmem:[%s2640_s11 + $0xd0] sm:$0xff] }
 0x44d   : > { %v1305_v5 = vadd.f32 1.0, %v2111_v13 }
 0x44e   : > { %2114 = vrcp.f32 %v1286_v6  ;;  %v1298_v3 = vand.u32 2147483648, %v1286_v6  ;;  %v1296_v9 = vand.u32 2147483647, %v1286_v6  ;;  %vm1292_vm3 = vweird.f32 %v1286_v6 }
 0x44f   : > { %2116 = vrcp.f32 %v1305_v5  ;;  %v1317_v4 = vand.u32 2147483648, %v1305_v5  ;;  %v1315_v16 = vand.u32 2147483647, %v1305_v5  ;;  %vm1311_vm4 = vweird.f32 %v1305_v5 }
 0x450   : > { %v1299_v54 = vor.u32 1.1754944e-38, %v1298_v3  ;;  %vm1297_vm7 = vcmp.eq.f32.partialorder %v1296_v9, 8.507059e+37 }
 0x451   : > { %v1318_v29 = vor.u32 1.1754944e-38, %v1317_v4  ;;  %vm1316_vm8 = vcmp.eq.f32.partialorder %v1315_v16, 8.507059e+37 }
 0x452   : > { %v2113_v11 = vpop.eup %2112 }
 0x453   : > { %v1325_v7 = vadd.f32 1.0, %v2113_v11 }
 0x454   : > { %v2115_v12 = vpop.eup %2114 }
 0x455   : > { %v2117_v19 = vpop.eup %2116  ;;  %v1288_v10 = vmul.f32 %v2115_v12, %v1286_v6  ;;  %2118 = vrcp.f32 %v1325_v7  ;;  %vm1293_vm1 = vweird.f32 %v2115_v12  ;;  %v1337_v2 = vand.u32 2147483648, %v1325_v7 }
 0x456   : > { %v1307_v48 = vmul.f32 %v2117_v19, %v1305_v5  ;;  %2120 = vtanh.f32 %v1281_v15  ;;  %vm1312_vm2 = vweird.f32 %v2117_v19  ;;  %vm1294_vm5 = vmor %vm1292_vm3, %vm1293_vm1  ;;  %vm1331_vm11 = vweird.f32 %v1325_v7 }
 0x457   : > { %v1289_v25 = vsub.f32 1.0, %v1288_v10  ;;  %vm1313_vm6 = vmor %vm1311_vm4, %vm1312_vm2  ;;  %v1335_v38 = vand.u32 2147483647, %v1325_v7  ;;  %v1338_v58 = vor.u32 1.1754944e-38, %v1337_v2 }
 0x458   : > { %v1308_v22 = vsub.f32 1.0, %v1307_v48 }
 0x459   : > { %v1290_v26 = vmul.f32 %v2115_v12, %v1289_v25  ;;  %vm1336_vm13 = vcmp.eq.f32.partialorder %v1335_v38, 8.507059e+37 }
 0x45a   : > { %v1309_v17 = vmul.f32 %v2117_v19, %v1308_v22 }
 0x45b   : > { %v2119_v27 = vpop.eup %2118  ;;  %v1291_v24 = vadd.f32 %v2115_v12, %v1290_v26 }
 0x45c   : > { %v1310_v28 = vadd.f32 %v2117_v19, %v1309_v17  ;;  %v1327_v35 = vmul.f32 %v2119_v27, %v1325_v7  ;;  %v2121_v32 = vpop.eup %2120  ;;  %vm1332_vm10 = vweird.f32 %v2119_v27 }
 0x45d   : > { %v1295_v30 = vsel %vm1294_vm5, %v2115_v12, %v1291_v24  ;;  %vm1333_vm12 = vmor %vm1331_vm11, %vm1332_vm10 }
 0x45e   : > { %v1300_v33 = vsel %vm1297_vm7, %v1299_v54, %v1295_v30  ;;  %v1314_v34 = vsel %vm1313_vm6, %v2117_v19, %v1310_v28  ;;  %v1328_v37 = vsub.f32 1.0, %v1327_v35  ;;  %v1510_v28 = vstv %s1509_s29 }
 0x45f   : > { %v1319_v41 = vsel %vm1316_vm8, %v1318_v29, %v1314_v34  ;;  %v1342_v45 = vmul.f32 %v2121_v32, %v1300_v33  ;;  %vm1511_vm6 = vcmp.eq.s32.totalorder %v1510_v28, 1 }
 0x460   : > { %v1341_v49 = vmul.f32 %v1319_v41, %v3488_v23  ;;  %v1329_v61 = vmul.f32 %v2119_v27, %v1328_v37 }
 0x462   : > { %v1343_v42 = vadd.f32 %v1342_v45, %v1341_v49  ;;  %v1330_v53 = vadd.f32 %v2119_v27, %v1329_v61 }
 0x464   : > { %2122 = vtanh.f32 %v1343_v42  ;;  %v3578_v1 = vsel %vm1350_vm9, %v1343_v42, %v3488_v23  ;;  %v1334_v57 = vsel %vm1333_vm12, %v2119_v27, %v1330_v53  ;;  %v1905_v23 = vld [vmem:[%s2640_s11 + $0xc0] sm:$0xff] }
 0x465   : > { %v1339_v46 = vsel %vm1336_vm13, %v1338_v58, %v1334_v57 }
 0x46a   : > { %v2123_v0 = vpop.eup %2122 }
 0x46b   : > { %v1345_v39 = vmul.f32 %v2123_v0, %v1339_v46  ;;  %v1914_v46 = vld [vmem:[%s2640_s11 + $0xe8] sm:$0xff] }
 0x46d   : > { %v3582_v47 = vsel %vm1350_vm9, %v1345_v39, %v3492_v20 }
 0x46e   : > { %1904 = vst [vmem:[%s2655_s26 + $0x28] sm:$0xff] %v3582_v47  ;;  %1376 = vmatmul.f32.vlgmr.msra.gmra.mxu0 %v3582_v47  ;;  %1396 = vmatmul.f32.vlgmr.msra.gmra.mxu1 %v3582_v47 }
 0x46f   : > { %1416 = vmatmul.f32.vlgmr.msra.gmra.mxu2 %v3582_v47  ;;  %1436 = vmatmul.f32.vlgmr.msra.gmra.mxu3 %v3582_v47 }
 0x4eb   : > { %v1377_v60 = vpop.f32.mrf.mxu0  ;;  %v1397_v63 = vpop.f32.mrf.mxu1 }
 0x4ec   : > { %v1440_v44 = vadd.f32 %v1905_v23, %v1377_v60  ;;  %v1441_v59 = vadd.f32 %v1906_v40, %v1397_v63 }
 0x4ee   : > { %v1909_v55 = vmul.f32 -1.442695, %v1440_v44  ;;  %v1910_v20 = vmul.f32 -1.442695, %v1441_v59  ;;  %v1916_v44 = vld [vmem:[%s2640_s11 + $0xf8] sm:$0xff] }
 0x4f0   : > { %2124 = vpow2.f32 %v1909_v55 }
 0x4f1   : > { %2126 = vpow2.f32 %v1910_v20 }
 0x4f2   : > { %v1437_v43 = vpop.f32.mrf.mxu3  ;;  %v1417_v13 = vpop.f32.mrf.mxu2 }
 0x4f3   : > { %v1443_v56 = vadd.f32 %v1908_v36, %v1437_v43  ;;  %v1442_v14 = vadd.f32 %v1907_v21, %v1417_v13 }
 0x4f5   : > { %v1911_v51 = vmul.f32 -1.442695, %v1443_v56 }
 0x4f6   : > { %v2125_v50 = vpop.eup %2124 }
 0x4f7   : > { %v2127_v52 = vpop.eup %2126  ;;  %v1447_v8 = vadd.f32 1.0, %v2125_v50  ;;  %2128 = vpow2.f32 %v1911_v51  ;;  %v1915_v50 = vld [vmem:[%s2640_s11 + $0xf0] sm:$0xff] }
 0x4f8   : > { %v1466_v62 = vadd.f32 1.0, %v2127_v52 }
 0x4f9   : > { %2130 = vrcp.f32 %v1447_v8  ;;  %v1459_v10 = vand.u32 2147483648, %v1447_v8  ;;  %v1457_v22 = vand.u32 2147483647, %v1447_v8  ;;  %vm1453_vm0 = vweird.f32 %v1447_v8 }
 0x4fa   : > { %2132 = vrcp.f32 %v1466_v62  ;;  %v1478_v48 = vand.u32 2147483648, %v1466_v62  ;;  %v1476_v4 = vand.u32 2147483647, %v1466_v62  ;;  %vm1472_vm1 = vweird.f32 %v1466_v62 }
 0x4fb   : > { %v1460_v17 = vor.u32 1.1754944e-38, %v1459_v10  ;;  %vm1458_vm4 = vcmp.eq.f32.partialorder %v1457_v22, 8.507059e+37 }
 0x4fc   : > { %v1479_v24 = vor.u32 1.1754944e-38, %v1478_v48  ;;  %vm1477_vm5 = vcmp.eq.f32.partialorder %v1476_v4, 8.507059e+37 }
 0x4fd   : > { %v2129_v6 = vpop.eup %2128 }
 0x4fe   : > { %v1486_v5 = vadd.f32 1.0, %v2129_v6 }
 0x4ff   : > { %v2131_v18 = vpop.eup %2130 }
 0x500   : > { %v2133_v11 = vpop.eup %2132  ;;  %v1449_v7 = vmul.f32 %v2131_v18, %v1447_v8  ;;  %2134 = vrcp.f32 %v1486_v5  ;;  %vm1454_vm14 = vweird.f32 %v2131_v18  ;;  %v1498_v49 = vand.u32 2147483648, %v1486_v5 }
 0x501   : > { %v1468_v12 = vmul.f32 %v2133_v11, %v1466_v62  ;;  %2136 = vtanh.f32 %v1442_v14  ;;  %vm1473_vm15 = vweird.f32 %v2133_v11  ;;  %vm1455_vm2 = vmor %vm1453_vm0, %vm1454_vm14  ;;  %vm1492_vm8 = vweird.f32 %v1486_v5 }
 0x502   : > { %v1450_v15 = vsub.f32 1.0, %v1449_v7  ;;  %vm1474_vm3 = vmor %vm1472_vm1, %vm1473_vm15  ;;  %v1496_v42 = vand.u32 2147483647, %v1486_v5  ;;  %v1499_v2 = vor.u32 1.1754944e-38, %v1498_v49 }
 0x503   : > { %v1469_v19 = vsub.f32 1.0, %v1468_v12 }
 0x504   : > { %v1451_v25 = vmul.f32 %v2131_v18, %v1450_v15  ;;  %vm1497_vm10 = vcmp.eq.f32.partialorder %v1496_v42, 8.507059e+37 }
 0x505   : > { %v1470_v3 = vmul.f32 %v2133_v11, %v1469_v19 }
 0x506   : > { %v2135_v26 = vpop.eup %2134  ;;  %v1452_v9 = vadd.f32 %v2131_v18, %v1451_v25 }
 0x507   : > { %v1471_v16 = vadd.f32 %v2133_v11, %v1470_v3  ;;  %v1488_v27 = vmul.f32 %v2135_v26, %v1486_v5  ;;  %v2137_v35 = vpop.eup %2136  ;;  %vm1493_vm7 = vweird.f32 %v2135_v26 }
 0x508   : > { %v1456_v54 = vsel %vm1455_vm2, %v2131_v18, %v1452_v9  ;;  %vm1494_vm9 = vmor %vm1492_vm8, %vm1493_vm7 }
 0x509   : > { %v1461_v29 = vsel %vm1458_vm4, %v1460_v17, %v1456_v54  ;;  %v1475_v30 = vsel %vm1474_vm3, %v2133_v11, %v1471_v16  ;;  %v1489_v31 = vsub.f32 1.0, %v1488_v27 }
 0x50a   : > { %v1480_v32 = vsel %vm1477_vm5, %v1479_v24, %v1475_v30  ;;  %v1503_v33 = vmul.f32 %v2137_v35, %v1461_v29 }
 0x50b   : > { %v1502_v34 = vmul.f32 %v1480_v32, %v3578_v1  ;;  %v1490_v37 = vmul.f32 %v2135_v26, %v1489_v31 }
 0x50d   : > { %v1504_v41 = vadd.f32 %v1503_v33, %v1502_v34  ;;  %v1491_v45 = vadd.f32 %v2135_v26, %v1490_v37 }
 0x50f   : > { %2138 = vtanh.f32 %v1504_v41  ;;  %v3604_v61 = vsel %vm1511_vm6, %v1504_v41, %v3578_v1  ;;  %v1495_v53 = vsel %vm1494_vm9, %v2135_v26, %v1491_v45  ;;  %v1913_v1 = vld [vmem:[%s2640_s11 + $0xe0] sm:$0xff]  ;;  %s1670_s11 = scalar_select %p3621_p0, 1, 0 }
 0x510   : > { %v1500_v57 = vsel %vm1497_vm10, %v1499_v2, %v1495_v53 }
 0x511   : > { %v1671_v16 = vstv %s1670_s11  ;;  %s3644_s11 = sshll.u32 %s2482_s16, 4  ;;  %s1720_s11 = int_to_ptr.vmem [resolvable:$true] %s3644_s11 }
 0x512   : > { %vm1672_vm3 = vcmp.eq.s32.totalorder %v1671_v16, 1 }
 0x515   : > { %v2139_v38 = vpop.eup %2138 }
 0x516   : > { %v1506_v58 = vmul.f32 %v2139_v38, %v1500_v57 }
 0x518   : > { %v3608_v0 = vsel %vm1511_vm6, %v1506_v58, %v3582_v47 }
 0x519   : > { %1912 = vst [vmem:[%s2655_s26 + $0x30] sm:$0xff] %v3608_v0  ;;  %1537 = vmatmul.f32.vlgmr.msrb.gmra.mxu0 %v3608_v0  ;;  %1557 = vmatmul.f32.vlgmr.msrb.gmra.mxu1 %v3608_v0 }
 0x51a   : > { %1577 = vmatmul.f32.vlgmr.msrb.gmra.mxu2 %v3608_v0  ;;  %1597 = vmatmul.f32.vlgmr.msrb.gmra.mxu3 %v3608_v0 }
 0x596   : > { %v1538_v39 = vpop.f32.mrf.mxu0  ;;  %v1558_v23 = vpop.f32.mrf.mxu1 }
 0x597   : > { %v1601_v40 = vadd.f32 %v1913_v1, %v1538_v39  ;;  %v1602_v60 = vadd.f32 %v1914_v46, %v1558_v23 }
 0x599   : > { %v1917_v63 = vmul.f32 -1.442695, %v1601_v40  ;;  %v1918_v47 = vmul.f32 -1.442695, %v1602_v60 }
 0x59b   : > { %2140 = vpow2.f32 %v1917_v63 }
 0x59c   : > { %2142 = vpow2.f32 %v1918_v47 }
 0x59d   : > { %v1598_v59 = vpop.f32.mrf.mxu3  ;;  %v1578_v52 = vpop.f32.mrf.mxu2 }
 0x59e   : > { %v1604_v55 = vadd.f32 %v1916_v44, %v1598_v59  ;;  %v1603_v13 = vadd.f32 %v1915_v50, %v1578_v52 }
 0x5a0   : > { %v1919_v20 = vmul.f32 -1.442695, %v1604_v55 }
 0x5a1   : > { %v2141_v36 = vpop.eup %2140 }
 0x5a2   : > { %v2143_v43 = vpop.eup %2142  ;;  %v1608_v56 = vadd.f32 1.0, %v2141_v36  ;;  %2144 = vpow2.f32 %v1919_v20 }
 0x5a3   : > { %v1627_v51 = vadd.f32 1.0, %v2143_v43 }
 0x5a4   : > { %2146 = vrcp.f32 %v1608_v56  ;;  %v1620_v7 = vand.u32 2147483648, %v1608_v56  ;;  %v1618_v19 = vand.u32 2147483647, %v1608_v56  ;;  %vm1614_vm13 = vweird.f32 %v1608_v56 }
 0x5a5   : > { %2148 = vrcp.f32 %v1627_v51  ;;  %v1639_v12 = vand.u32 2147483648, %v1627_v51  ;;  %v1637_v48 = vand.u32 2147483647, %v1627_v51  ;;  %vm1633_vm14 = vweird.f32 %v1627_v51 }
 0x5a6   : > { %v1621_v3 = vor.u32 1.1754944e-38, %v1620_v7  ;;  %vm1619_vm1 = vcmp.eq.f32.partialorder %v1618_v19, 8.507059e+37 }
 0x5a7   : > { %v1640_v9 = vor.u32 1.1754944e-38, %v1639_v12  ;;  %vm1638_vm2 = vcmp.eq.f32.partialorder %v1637_v48, 8.507059e+37 }
 0x5a8   : > { %v2145_v8 = vpop.eup %2144 }
 0x5a9   : > { %v1647_v62 = vadd.f32 1.0, %v2145_v8 }
 0x5aa   : > { %v2147_v21 = vpop.eup %2146 }
 0x5ab   : > { %v2149_v6 = vpop.eup %2148  ;;  %v1610_v5 = vmul.f32 %v2147_v21, %v1608_v56  ;;  %2150 = vrcp.f32 %v1647_v62  ;;  %vm1615_vm11 = vweird.f32 %v2147_v21  ;;  %v1659_v34 = vand.u32 2147483648, %v1647_v62 }
 0x5ac   : > { %v1629_v18 = vmul.f32 %v2149_v6, %v1627_v51  ;;  %2152 = vtanh.f32 %v1603_v13  ;;  %vm1634_vm12 = vweird.f32 %v2149_v6  ;;  %vm1616_vm15 = vmor %vm1614_vm13, %vm1615_vm11  ;;  %vm1653_vm5 = vweird.f32 %v1647_v62 }
 0x5ad   : > { %v1611_v14 = vsub.f32 1.0, %v1610_v5  ;;  %vm1635_vm0 = vmor %vm1633_vm14, %vm1634_vm12  ;;  %v1657_v41 = vand.u32 2147483647, %v1647_v62  ;;  %v1660_v49 = vor.u32 1.1754944e-38, %v1659_v34 }
 0x5ae   : > { %v1630_v11 = vsub.f32 1.0, %v1629_v18 }
 0x5af   : > { %v1612_v15 = vmul.f32 %v2147_v21, %v1611_v14  ;;  %vm1658_vm7 = vcmp.eq.f32.partialorder %v1657_v41, 8.507059e+37 }
 0x5b0   : > { %v1631_v10 = vmul.f32 %v2149_v6, %v1630_v11 }
 0x5b1   : > { %v2151_v25 = vpop.eup %2150  ;;  %v1613_v22 = vadd.f32 %v2147_v21, %v1612_v15 }
 0x5b2   : > { %v1632_v4 = vadd.f32 %v2149_v6, %v1631_v10  ;;  %v1649_v26 = vmul.f32 %v2151_v25, %v1647_v62  ;;  %v2153_v27 = vpop.eup %2152  ;;  %vm1654_vm4 = vweird.f32 %v2151_v25 }
 0x5b3   : > { %v1617_v17 = vsel %vm1616_vm15, %v2147_v21, %v1613_v22  ;;  %vm1655_vm6 = vmor %vm1653_vm5, %vm1654_vm4 }
 0x5b4   : > { %v1622_v24 = vsel %vm1619_vm1, %v1621_v3, %v1617_v17  ;;  %v1636_v54 = vsel %vm1635_vm0, %v2149_v6, %v1632_v4  ;;  %v1650_v28 = vsub.f32 1.0, %v1649_v26 }
 0x5b5   : > { %v1641_v35 = vsel %vm1638_vm2, %v1640_v9, %v1636_v54  ;;  %v1664_v29 = vmul.f32 %v2153_v27, %v1622_v24 }
 0x5b6   : > { %v1663_v30 = vmul.f32 %v1641_v35, %v3604_v61  ;;  %v1651_v31 = vmul.f32 %v2151_v25, %v1650_v28 }
 0x5b8   : > { %v1665_v32 = vadd.f32 %v1664_v29, %v1663_v30  ;;  %v1652_v33 = vadd.f32 %v2151_v25, %v1651_v31 }
 0x5ba   : > { %2154 = vtanh.f32 %v1665_v32  ;;  %v1674_v37 = vsel %vm1672_vm3, %v1665_v32, %v3604_v61  ;;  %v1656_v45 = vsel %vm1655_vm6, %v2151_v25, %v1652_v33 }
 0x5bb   : > { %1678 = vst [vmem:[#allocation13] sm:$0xff] %v1674_v37  ;;  %v1661_v42 = vsel %vm1658_vm7, %v1660_v49, %v1656_v45 }
 0x5c0   : > { %v2155_v61 = vpop.eup %2154 }
 0x5c1   : > { %v1667_v53 = vmul.f32 %v2155_v61, %v1661_v42 }
 0x5c3   : > { %v1673_v2 = vsel %vm1672_vm3, %v1667_v53, %v3608_v0 }
 0x5c4   : > { %1920 = vst [vmem:[%s2655_s26 + $0x38] sm:$0xff] %v1673_v2 }
 0x5c5   : > { %1677 = vst [vmem:[#allocation11] sm:$0xff] %v1673_v2 }
 0x5c6   : > { %2367 = shalt.err (!%p2364_p8)
}
 0x5c7   : > { %s2483_s17 = smov 128   ;;  %s2484_s26 = smov 8  }
 0x5c8   : > { %1947 = dma.vmem_to_hbm [thread:$0]  (%p2606_p5), %s3640_s10, 1024, %s3642_s18, %s1680_s9, %s2483_s17, %s2483_s17, %s2484_s26  }
 0x5c9   : > { %p3999_p9 = scmp.eq.s32.totalorder %s2541_s25, 1 }
 0x5cb   : > { %1949 = dma.vmem_to_hbm [thread:$0]  (%p3999_p9), %s1708_s20, 128, %s1710_s15, [#allocation12]  }
 0x5cc   : > { %p4000_p12 = pmov %p3999_p9  ;;  %p4001_p11 = pmov %p3999_p9 }
 0x5ce   : > { %1951 = dma.vmem_to_hbm [thread:$0]  (%p4000_p12), %s1720_s11, 128, %s1722_s30, [#allocation12]  }
 0x5cf   : > { %2453 = dma.done.wait (%p4001_p11), [#allocation12], 256   ;;  %p4002_p13 = pmov %p3999_p9 }
 0x5d1   : > { %2455 = vsyncadd (%p4002_p13), [#allocation12], 4294967040 }
 0x5d2 PF: > { %s1743_s0 = sand.u32 1, %s2462_s21   ;;  %p4003_p0 = scmp.ge.s32.totalorder %s2474_s24, 2 }
 0x5d3   : > { %s1744_s13 = scalar_lea.sflag [#allocation4], %s1743_s0 }
 0x5d4   : > { %p1972_p3 = pnand %p4003_p0, %p2555_p6 }
 0x5d6   : > { %p1973_p7 = pneg %p1972_p3 }
 0x5d8   : > { %2457 = dma.done.wait (%p1973_p7), %s1744_s13, 1024  }
 0x5d9   : > { %2459 = vsyncadd (%p1973_p7), %s1744_s13, 4294966272  ;;  %p23_p5 = scmp.ge.s32.totalorder %s2591_s7, 4   ;;  %s4004_s21 = smov %s2466_s22 }
 0x5da   : > { %s4005_s22 = smov %s2470_s23  ;;  %s4006_s23 = smov %s2602_s12 }
 0x5db   : > { %s4007_s24 = smov %s2591_s7  ;;  %25 = sbr.rel (!%p23_p5) target bundleno = 10 (0xa), region = 127 }
 0x5e0   :  { %1750 = vsyncpa [#allocation3], 1 }
 0x5e1   :  { %1752 = vsyncpa [#allocation3 + $0x1], 1 }
 0x5e2   :  { %1753 = vsyncpa [#allocation6], 1 }
 0x5e3   :  { %1754 = vsyncpa [#allocation9], 1 }
 0x5e4   :  { %1755 = vsyncpa [#allocation4], 1 }
 0x5e5   :  { %1757 = vsyncpa [#allocation4 + $0x1], 1 }
 0x5e6   :  { %1758 = vsyncpa [#allocation12], 1 }

</bundles_post_ra>
